<compile_context>
chip_gen: v7x
topology: tpu7x:2x2x1
jax: 0.10.0
libtpu: 0.0.40
codegen_flags: <defaults>
</compile_context>

<pallas_src>
import functools

import jax
import jax.numpy as jnp
import numpy as np
from jax.experimental import pallas as pl
from jax.experimental.pallas import tpu as pltpu

LANE = 128


def _round_up(v, m):
    return (v + m - 1) // m * m


# --------------------------- fused 2-layer kernel ---------------------------
def _gat2_kernel(adj_ref, x_ref, w1_ref, b1_ref, w2_ref, b2_ref, out_ref, *, c1, c2):
    # int8 adjacency -> additive -1e30 mask bias, built once, reused by both layers.
    # (rows = dst, cols = src; padded src columns are masked, padded dst rows are
    #  sliced off outside the kernel, so padding is semantically inert.)
    mask = adj_ref[...].astype(jnp.float32) > 0.0           # (Np, Np)
    neg = jnp.where(mask, 0.0, -1e30)                       # (Np, Np) additive bias

    def layer(x, w_ref, b_ref, c, apply_relu):
        # One lane-dense MXU pass producing [xs | lin | alpha_src | alpha_dst].
        y = jnp.dot(x, w_ref[...], preferred_element_type=jnp.float32)
        xs = y[:, 0:c]                                      # (Np, c)  = x @ Wsrc
        lin = y[:, c:2 * c]                                 # (Np, c)  = x @ Wlin
        a_s = y[:, 2 * c:2 * c + 1]                         # (Np, 1)  per-source logit
        a_d = y[:, 2 * c + LANE:2 * c + LANE + 1]           # (Np, 1)  per-dest logit

        e = a_d + a_s.T                                     # (Np, Np) raw logits
        e = jnp.maximum(e, 0.2 * e)                         # leaky_relu(0.2)
        e = e + neg                                         # mask (self-loops ensure
                                                            #  every real row has a hit)
        e = e - jnp.max(e, axis=-1, keepdims=True)          # stable softmax
        p = jnp.exp(e)
        p = p * pl.reciprocal(jnp.sum(p, axis=-1, keepdims=True), approx=False)

        o = jnp.dot(p, xs, preferred_element_type=jnp.float32) + lin + b_ref[...]
        return jnp.maximum(o, 0.0) if apply_relu else o

    h = layer(x_ref[...], w1_ref, b1_ref, c1, True)         # hidden stays on-chip
    out_ref[...] = layer(h, w2_ref, b2_ref, c2, False)


# ------------------------------- wrappers -----------------------------------
def _pack_layer_params(layer_params, f_in_pad, f_out_pad):
    """Fold attention vectors into the weights and build one lane-dense weight slab."""
    wsrc, wdst, asrc, adst, bconv, wlin, blin = layer_params
    f_in, f_out = wsrc.shape
    # alpha_src = (x @ Wsrc) @ asrc^T == x @ (Wsrc @ asrc^T)   (same for dst)
    a_src_vec = wsrc @ asrc.T                                # (f_in, 1)
    a_dst_vec = wdst @ adst.T                                # (f_in, 1)

    width = 2 * f_out_pad + 2 * LANE
    w = jnp.zeros((f_in_pad, width), jnp.float32)
    w = w.at[:f_in, :f_out].set(wsrc)
    w = w.at[:f_in, f_out_pad:f_out_pad + f_out].set(wlin)
    w = w.at[:f_in, 2 * f_out_pad].set(a_src_vec[:, 0])          # 128-aligned column
    w = w.at[:f_in, 2 * f_out_pad + LANE].set(a_dst_vec[:, 0])   # 128-aligned column

    b = jnp.zeros((1, f_out_pad), jnp.float32).at[:, :f_out].set(bconv + blin)
    return w, b


def gat_forward(x, adj, params):
    p1, p2 = params
    n, f_in = x.shape
    hid = p1[0].shape[1]
    out_c = p2[0].shape[1]

    n_p = _round_up(n, LANE)
    fin_p = _round_up(f_in, LANE)
    hid_p = _round_up(hid, LANE)
    out_p = _round_up(out_c, LANE)

    # Zero-padded, lane-aligned inputs.
    x_p = jnp.zeros((n_p, fin_p), jnp.float32).at[:n, :f_in].set(x)
    adj_p = jnp.zeros((n_p, n_p), jnp.int8).at[:n, :n].set((adj > 0).astype(jnp.int8))

    w1, b1 = _pack_layer_params(p1, fin_p, hid_p)
    w2, b2 = _pack_layer_params(p2, hid_p, out_p)

    vmem = pl.BlockSpec(memory_space=pltpu.MemorySpace.VMEM)
    out_pad = pl.pallas_call(
        functools.partial(_gat2_kernel, c1=hid_p, c2=out_p),
        out_shape=jax.ShapeDtypeStruct((n_p, out_p), jnp.float32),
        in_specs=[vmem] * 6,
        out_specs=vmem,
        compiler_params=pltpu.CompilerParams(vmem_limit_bytes=32 * 1024 * 1024),
    )(adj_p, x_p, w1, b1, w2, b2)
    return out_pad[:n, :out_c]


# ---------------- pure-JAX reference (original unfolded math) ---------------
def _ref_layer(adj, x, wsrc, wdst, asrc, adst, bconv, wlin, blin, apply_relu):
    xs = x @ wsrc
    xd = x @ wdst
    a_s = jnp.sum(xs * asrc, axis=-1, keepdims=True)
    a_d = jnp.sum(xd * adst, axis=-1, keepdims=True)
    e = a_d + a_s.T
    e = jnp.where(e > 0, e, 0.2 * e)
    e = jnp.where(adj > 0, e, -1e30)
    p = jax.nn.softmax(e, axis=-1)
    out = p @ xs + bconv + x @ wlin + blin
    return jnp.maximum(out, 0.0) if apply_relu else out


def _ref_forward(x, adj, params):
    p1, p2 = params
    h = _ref_layer(adj, x, *p1, True)
    return _ref_layer(adj, h, *p2, False)


# ---------------------------------------------------------------------------
def make_layer_params(key, f_in, f_out):
    ks = jax.random.split(key, 7)
    scale_in = 1.0 / np.sqrt(f_in)
    wsrc = jax.random.normal(ks[0], (f_in, f_out), jnp.float32) * scale_in
    wdst = jax.random.normal(ks[1], (f_in, f_out), jnp.float32) * scale_in
    asrc = jax.random.normal(ks[2], (1, f_out), jnp.float32) * (1.0 / np.sqrt(f_out))
    adst = jax.random.normal(ks[3], (1, f_out), jnp.float32) * (1.0 / np.sqrt(f_out))
    bconv = jax.random.normal(ks[4], (1, f_out), jnp.float32) * 0.1
    wlin = jax.random.normal(ks[5], (f_in, f_out), jnp.float32) * scale_in
    blin = jax.random.normal(ks[6], (1, f_out), jnp.float32) * 0.1
    return (wsrc, wdst, asrc, adst, bconv, wlin, blin)


if __name__ == "__main__":
    N, F_IN, HID, OUT = 16, 8, 32, 8

    key = jax.random.PRNGKey(0)
    k_x, k_e, k_p1, k_p2 = jax.random.split(key, 4)

    # Node features.
    x = jax.random.normal(k_x, (N, F_IN), jnp.float32)

    # Deterministic edge_index: directed ring both ways + a few extra edges,
    # then self loops (PyG GATConv default add_self_loops=True).
    src, dst = [], []
    for i in range(N):
        src += [i, (i + 1) % N]
        dst += [(i + 1) % N, i]
    extra = np.asarray(jax.random.randint(k_e, (2, 8), 0, N))
    src += list(extra[0])
    dst += list(extra[1])
    edge_index = np.stack([np.asarray(src), np.asarray(dst)])  # (2, E)

    # Dense adjacency mask, adj[dst, src] = 1, with self loops.
    adj = np.zeros((N, N), np.float32)
    adj[edge_index[1], edge_index[0]] = 1.0
    adj[np.arange(N), np.arange(N)] = 1.0
    adj = jnp.asarray(adj)

    params = (make_layer_params(k_p1, F_IN, HID),
              make_layer_params(k_p2, HID, OUT))

    out = jax.block_until_ready(gat_forward(x, adj, params))
    ref = jax.block_until_ready(_ref_forward(x, adj, params))

    assert out.shape == (N, OUT)
    np.testing.assert_allclose(np.asarray(out), np.asarray(ref), rtol=1e-4, atol=1e-4)
    print("KERNEL_OK")
</pallas_src>

<mosaic_0001>
module attributes {stable_mosaic.version = 11 : i64} {
  func.func @_gat2_kernel(%arg0: memref<128x128xi8, #tpu.memory_space<vmem>>, %arg1: memref<128x128xf32, #tpu.memory_space<vmem>>, %arg2: memref<128x512xf32, #tpu.memory_space<vmem>>, %arg3: memref<1x128xf32, #tpu.memory_space<vmem>>, %arg4: memref<128x512xf32, #tpu.memory_space<vmem>>, %arg5: memref<1x128xf32, #tpu.memory_space<vmem>>, %arg6: memref<128x128xf32, #tpu.memory_space<vmem>>) attributes {dimension_semantics = [], scalar_prefetch = 0 : i64, scratch_operands = 0 : i64, tpu.core_type = #tpu.core_type<tc>} {
    %c0 = arith.constant 0 : index
    %c0_0 = arith.constant 0 : index
    %0 = vector.load %arg0[%c0, %c0_0] : memref<128x128xi8, #tpu.memory_space<vmem>>, vector<128x128xi8>
    %1 = arith.sitofp %0 : vector<128x128xi8> to vector<128x128xf32>
    %cst = arith.constant 0.000000e+00 : f32
    %2 = vector.broadcast %cst : f32 to vector<128x128xf32>
    %3 = arith.cmpf ogt, %1, %2 : vector<128x128xf32>
    %cst_1 = arith.constant 0.000000e+00 : f32
    %cst_2 = arith.constant -1.000000e+30 : f32
    %4 = vector.broadcast %cst_1 : f32 to vector<128x128xf32>
    %5 = vector.broadcast %cst_2 : f32 to vector<128x128xf32>
    %6 = arith.select %3, %4, %5 : vector<128x128xi1>, vector<128x128xf32>
    %c0_3 = arith.constant 0 : index
    %c0_4 = arith.constant 0 : index
    %7 = vector.load %arg1[%c0_3, %c0_4] : memref<128x128xf32, #tpu.memory_space<vmem>>, vector<128x128xf32>
    %c0_5 = arith.constant 0 : index
    %c0_6 = arith.constant 0 : index
    %8 = vector.load %arg2[%c0_5, %c0_6] : memref<128x512xf32, #tpu.memory_space<vmem>>, vector<128x512xf32>
    %cst_7 = arith.constant dense<0.000000e+00> : vector<128x512xf32>
    %9 = tpu.matmul %7, %8, %cst_7 {dimension_numbers = #tpu.dot_dimension_numbers<[1], [0], [0], [1], [0, 0, 1, 1], [], []>} : vector<128x128xf32>, vector<128x512xf32>, vector<128x512xf32> -> vector<128x512xf32>
    %10 = vector.extract_strided_slice %9 {offsets = [0, 0], sizes = [128, 128], strides = [1, 1]} : vector<128x512xf32> to vector<128x128xf32>
    %11 = vector.extract_strided_slice %9 {offsets = [0, 128], sizes = [128, 128], strides = [1, 1]} : vector<128x512xf32> to vector<128x128xf32>
    %12 = vector.extract_strided_slice %9 {offsets = [0, 256], sizes = [128, 1], strides = [1, 1]} : vector<128x512xf32> to vector<128x1xf32>
    %13 = vector.extract_strided_slice %9 {offsets = [0, 384], sizes = [128, 1], strides = [1, 1]} : vector<128x512xf32> to vector<128x1xf32>
    %14 = tpu.transpose %12, [1, 0] : vector<128x1xf32> -> vector<1x128xf32>
    %15 = vector.broadcast %13 : vector<128x1xf32> to vector<128x128xf32>
    %16 = vector.broadcast %14 : vector<1x128xf32> to vector<128x128xf32>
    %17 = arith.addf %15, %16 : vector<128x128xf32>
    %cst_8 = arith.constant 2.000000e-01 : f32
    %18 = vector.broadcast %cst_8 : f32 to vector<128x128xf32>
    %19 = arith.mulf %18, %17 : vector<128x128xf32>
    %20 = arith.maximumf %17, %19 : vector<128x128xf32>
    %21 = arith.addf %20, %6 : vector<128x128xf32>
    %cst_9 = arith.constant dense<0xFF800000> : vector<128xf32>
    %22 = vector.multi_reduction <maximumf>, %21, %cst_9 [1] : vector<128x128xf32> to vector<128xf32>
    %23 = vector.shape_cast %22 : vector<128xf32> to vector<128x1xf32>
    %24 = vector.broadcast %23 : vector<128x1xf32> to vector<128x128xf32>
    %25 = arith.subf %21, %24 : vector<128x128xf32>
    %26 = math.exp %25 : vector<128x128xf32>
    %cst_10 = arith.constant dense<0.000000e+00> : vector<128xf32>
    %27 = vector.multi_reduction <add>, %26, %cst_10 [1] : vector<128x128xf32> to vector<128xf32>
    %28 = vector.shape_cast %27 : vector<128xf32> to vector<128x1xf32>
    %29 = tpu.reciprocal %28 : vector<128x1xf32> -> vector<128x1xf32>
    %30 = vector.broadcast %29 : vector<128x1xf32> to vector<128x128xf32>
    %31 = arith.mulf %26, %30 : vector<128x128xf32>
    %cst_11 = arith.constant dense<0.000000e+00> : vector<128x128xf32>
    %32 = tpu.matmul %31, %10, %cst_11 {dimension_numbers = #tpu.dot_dimension_numbers<[1], [0], [0], [1], [0, 0, 1, 1], [], []>} : vector<128x128xf32>, vector<128x128xf32>, vector<128x128xf32> -> vector<128x128xf32>
    %33 = arith.addf %32, %11 : vector<128x128xf32>
    %c0_12 = arith.constant 0 : index
    %c0_13 = arith.constant 0 : index
    %34 = vector.load %arg3[%c0_12, %c0_13] : memref<1x128xf32, #tpu.memory_space<vmem>>, vector<1x128xf32>
    %35 = vector.broadcast %34 : vector<1x128xf32> to vector<128x128xf32>
    %36 = arith.addf %33, %35 : vector<128x128xf32>
    %cst_14 = arith.constant 0.000000e+00 : f32
    %37 = vector.broadcast %cst_14 : f32 to vector<128x128xf32>
    %38 = arith.maximumf %36, %37 : vector<128x128xf32>
    %c0_15 = arith.constant 0 : index
    %c0_16 = arith.constant 0 : index
    %39 = vector.load %arg4[%c0_15, %c0_16] : memref<128x512xf32, #tpu.memory_space<vmem>>, vector<128x512xf32>
    %cst_17 = arith.constant dense<0.000000e+00> : vector<128x512xf32>
    %40 = tpu.matmul %38, %39, %cst_17 {dimension_numbers = #tpu.dot_dimension_numbers<[1], [0], [0], [1], [0, 0, 1, 1], [], []>} : vector<128x128xf32>, vector<128x512xf32>, vector<128x512xf32> -> vector<128x512xf32>
    %41 = vector.extract_strided_slice %40 {offsets = [0, 0], sizes = [128, 128], strides = [1, 1]} : vector<128x512xf32> to vector<128x128xf32>
    %42 = vector.extract_strided_slice %40 {offsets = [0, 128], sizes = [128, 128], strides = [1, 1]} : vector<128x512xf32> to vector<128x128xf32>
    %43 = vector.extract_strided_slice %40 {offsets = [0, 256], sizes = [128, 1], strides = [1, 1]} : vector<128x512xf32> to vector<128x1xf32>
    %44 = vector.extract_strided_slice %40 {offsets = [0, 384], sizes = [128, 1], strides = [1, 1]} : vector<128x512xf32> to vector<128x1xf32>
    %45 = tpu.transpose %43, [1, 0] : vector<128x1xf32> -> vector<1x128xf32>
    %46 = vector.broadcast %44 : vector<128x1xf32> to vector<128x128xf32>
    %47 = vector.broadcast %45 : vector<1x128xf32> to vector<128x128xf32>
    %48 = arith.addf %46, %47 : vector<128x128xf32>
    %cst_18 = arith.constant 2.000000e-01 : f32
    %49 = vector.broadcast %cst_18 : f32 to vector<128x128xf32>
    %50 = arith.mulf %49, %48 : vector<128x128xf32>
    %51 = arith.maximumf %48, %50 : vector<128x128xf32>
    %52 = arith.addf %51, %6 : vector<128x128xf32>
    %cst_19 = arith.constant dense<0xFF800000> : vector<128xf32>
    %53 = vector.multi_reduction <maximumf>, %52, %cst_19 [1] : vector<128x128xf32> to vector<128xf32>
    %54 = vector.shape_cast %53 : vector<128xf32> to vector<128x1xf32>
    %55 = vector.broadcast %54 : vector<128x1xf32> to vector<128x128xf32>
    %56 = arith.subf %52, %55 : vector<128x128xf32>
    %57 = math.exp %56 : vector<128x128xf32>
    %cst_20 = arith.constant dense<0.000000e+00> : vector<128xf32>
    %58 = vector.multi_reduction <add>, %57, %cst_20 [1] : vector<128x128xf32> to vector<128xf32>
    %59 = vector.shape_cast %58 : vector<128xf32> to vector<128x1xf32>
    %60 = tpu.reciprocal %59 : vector<128x1xf32> -> vector<128x1xf32>
    %61 = vector.broadcast %60 : vector<128x1xf32> to vector<128x128xf32>
    %62 = arith.mulf %57, %61 : vector<128x128xf32>
    %cst_21 = arith.constant dense<0.000000e+00> : vector<128x128xf32>
    %63 = tpu.matmul %62, %41, %cst_21 {dimension_numbers = #tpu.dot_dimension_numbers<[1], [0], [0], [1], [0, 0, 1, 1], [], []>} : vector<128x128xf32>, vector<128x128xf32>, vector<128x128xf32> -> vector<128x128xf32>
    %64 = arith.addf %63, %42 : vector<128x128xf32>
    %c0_22 = arith.constant 0 : index
    %c0_23 = arith.constant 0 : index
    %65 = vector.load %arg5[%c0_22, %c0_23] : memref<1x128xf32, #tpu.memory_space<vmem>>, vector<1x128xf32>
    %66 = vector.broadcast %65 : vector<1x128xf32> to vector<128x128xf32>
    %67 = arith.addf %64, %66 : vector<128x128xf32>
    %c0_24 = arith.constant 0 : index
    %c0_25 = arith.constant 0 : index
    %68 = vector.load %arg6[%c0_24, %c0_25] : memref<128x128xf32, #tpu.memory_space<vmem>>, vector<128x128xf32>
    tpu.vector_store %arg6[%c0_24, %c0_25], %67 {strides = array<i32>} : memref<128x128xf32, #tpu.memory_space<vmem>>, vector<128x128xf32>,
    return
  }
}

</mosaic_0001>

<bundles_post_ra>
// kernel: tpu_custom_call.1
= control target key start
LH: loop header
LB: loop body
LE: loop exit
PB: predicated region body
PF: predicated region fallthrough
CT: control target
= control target key end

     0   :  { %11 = vsyncpa [#allocation3], 0  ;;  %s3437_s0 = inlined_call_operand.hbm [shape: s8[128,128], index: 0, kind: input, shape index: {}]   ;;  %s3438_s1 = inlined_call_operand.hbm [shape: f32[128,128], index: 1, kind: input, shape index: {}]   ;;  %s3439_s2 = inlined_call_operand.hbm [shape: f32[128,512], index: 2, kind: input, shape index: {}]   ;;  %s3440_s3 = inlined_call_operand.vmem [shape: f32[1,128], index: 3, kind: input, shape index: {}]   ;;  %s3441_s4 = inlined_call_operand.hbm [shape: f32[128,512], index: 4, kind: input, shape index: {}]   ;;  %s3442_s5 = inlined_call_operand.vmem [shape: f32[1,128], index: 5, kind: input, shape index: {}]   ;;  %s3443_s6 = inlined_call_operand.hbm [shape: f32[128,128], index: 6, kind: output, shape index: {}]  }
   0x1   :  { %12 = vsyncpa [#allocation6], 0 }
   0x2   :  { %13 = vsyncpa [#allocation9], 0 }
   0x3   :  { %14 = vsyncpa [#allocation4], 0  ;;  %s2600_s21 = smov [#allocation5]   ;;  %s2601_s23 = smov [#allocation2]  }
   0x4   :  { %s32_s22 = sshll.u32 %s2600_s21, 4  ;;  %s20_s24 = sshll.u32 %s2601_s23, 4  ;;  %s33_s22 = int_to_ptr.vmem [resolvable:$true] %s32_s22  ;;  %s2647_s24 = int_to_ptr.vmem [resolvable:$true] %s20_s24 }
   0x5   :  { %s2482_s27 = scalar_lea.hbm %s3438_s1, 2048 }
   0x6   :  { %p2483_p0 = scmp.ne.s32.totalorder %s3438_s1, %s2482_s27  ;;  %p2486_p1 = scmp.lt.u32.totalorder %s2482_s27, %s3438_s1 }
   0x8   :  { %p2488_p2 = pnand %p2486_p1, %p2483_p0 }
   0xa   :  { %2491 = shalt.err (!%p2488_p2)
}
   0xb   :  { %s2492_s8 = scalar_lea.vmem %s33_s22, 2048  ;;  %p2497_p4 = scmp.lt.s32.totalorder %s33_s22, %s33_s22 }
   0xc   :  { %p2493_p3 = scmp.ne.s32.totalorder %s33_s22, %s2492_s8  ;;  %p2498_p5 = scmp.lt.s32.totalorder %s2492_s8, %s2492_s8 }
   0xe   :  { %p2499_p6 = por %p2498_p5, %p2497_p4 }
  0x10   :  { %p2500_p7 = pnand %p2499_p6, %p2493_p3 }
  0x12   :  { %2503 = shalt.err (!%p2500_p7)
}
  0x13   :  { %s2602_s9 = smov 128   ;;  %s2603_s10 = smov 8  }
  0x14   :  { %38 = dma.hbm_to_vmem [thread:$0]  %s3438_s1, 2048, %s33_s22, [#allocation6], %s2602_s9, %s2602_s9, %s2603_s10  }
  0x15   :  { %s2504_s15 = scalar_lea.hbm %s3437_s0, 512 }
  0x16   :  { %p2505_p8 = scmp.ne.s32.totalorder %s3437_s0, %s2504_s15  ;;  %p2508_p9 = scmp.lt.u32.totalorder %s2504_s15, %s3437_s0 }
  0x18   :  { %p2510_p10 = pnand %p2508_p9, %p2505_p8 }
  0x1a   :  { %2513 = shalt.err (!%p2510_p10)
}
  0x1b   :  { %s2514_s20 = scalar_lea.vmem %s2647_s24, 512  ;;  %p2519_p12 = scmp.lt.s32.totalorder %s2647_s24, %s2647_s24 }
  0x1c   :  { %p2515_p11 = scmp.ne.s32.totalorder %s2647_s24, %s2514_s20  ;;  %p2520_p13 = scmp.lt.s32.totalorder %s2514_s20, %s2514_s20 }
  0x1e   :  { %p2521_p0 = por %p2520_p13, %p2519_p12 }
  0x20   :  { %p2522_p1 = pnand %p2521_p0, %p2515_p11 }
  0x22   :  { %2525 = shalt.err (!%p2522_p1)
}
  0x23   :  { %26 = dma.hbm_to_vmem [thread:$0]  %s3437_s0, 512, %s2647_s24, [#allocation3], %s2602_s9, %s2602_s9, %s2603_s10  }
  0x24   :  { %s2604_s22 = smov [#allocation7]   ;;  %s2526_s27 = scalar_lea.hbm %s3439_s2, 8192 }
  0x25   :  { %s44_s23 = sshll.u32 %s2604_s22, 4  ;;  %p2527_p2 = scmp.ne.s32.totalorder %s3439_s2, %s2526_s27  ;;  %s45_s23 = int_to_ptr.vmem [resolvable:$true] %s44_s23 }
  0x26   :  { %p2530_p3 = scmp.lt.u32.totalorder %s2526_s27, %s3439_s2 }
  0x28   :  { %p2532_p4 = pnand %p2530_p3, %p2527_p2 }
  0x2a   :  { %2535 = shalt.err (!%p2532_p4)
}
  0x2b   :  { %s2536_s8 = scalar_lea.vmem %s45_s23, 8192  ;;  %p2541_p6 = scmp.lt.s32.totalorder %s45_s23, %s45_s23 }
  0x2c   :  { %p2537_p5 = scmp.ne.s32.totalorder %s45_s23, %s2536_s8  ;;  %p2542_p7 = scmp.lt.s32.totalorder %s2536_s8, %s2536_s8 }
  0x2e   :  { %p2543_p8 = por %p2542_p7, %p2541_p6 }
  0x30   :  { %p2544_p9 = pnand %p2543_p8, %p2537_p5 }
  0x32   :  { %2547 = shalt.err (!%p2544_p9)
}
  0x33   :  { %s2605_s0 = smov 512   ;;  %s2606_s24 = smov 32  }
  0x34   :  { %50 = dma.hbm_to_vmem [thread:$0]  %s3439_s2, 8192, %s45_s23, [#allocation6], %s2605_s0, %s2605_s0, %s2606_s24  }
  0x35   :  { %s2607_s13 = smov [#allocation8]   ;;  %s2548_s17 = scalar_lea.hbm %s3441_s4, 8192 }
  0x36   :  { %s58_s14 = sshll.u32 %s2607_s13, 4  ;;  %p2549_p10 = scmp.ne.s32.totalorder %s3441_s4, %s2548_s17  ;;  %s59_s14 = int_to_ptr.vmem [resolvable:$true] %s58_s14 }
  0x37   :  { %p2552_p11 = scmp.lt.u32.totalorder %s2548_s17, %s3441_s4 }
  0x39   :  { %p2554_p12 = pnand %p2552_p11, %p2549_p10 }
  0x3b   :  { %2557 = shalt.err (!%p2554_p12)
}
  0x3c   :  { %s2558_s21 = scalar_lea.vmem %s59_s14, 8192  ;;  %p2563_p0 = scmp.lt.s32.totalorder %s59_s14, %s59_s14 }
  0x3d   :  { %p2559_p13 = scmp.ne.s32.totalorder %s59_s14, %s2558_s21  ;;  %p2564_p1 = scmp.lt.s32.totalorder %s2558_s21, %s2558_s21 }
  0x3f   :  { %p2565_p2 = por %p2564_p1, %p2563_p0 }
  0x41   :  { %p2566_p3 = pnand %p2565_p2, %p2559_p13 }
  0x43   :  { %2569 = shalt.err (!%p2566_p3)
}
  0x44   :  { %64 = dma.hbm_to_vmem [thread:$0]  %s3441_s4, 8192, %s59_s14, [#allocation9], %s2605_s0, %s2605_s0, %s2606_s24  }
  0x45   :  { %2592 = dma.done.wait [#allocation3], 512  }
  0x46   :  { %2593 = vsyncadd [#allocation3], 4294966784 }
  0x47   :  { %2594 = dma.done.wait [#allocation6], 10240  }
  0x48   :  { %2595 = vsyncadd [#allocation6], 4294957056 }
  0x49   :  { %2596 = dma.done.wait [#allocation9], 8192  }
  0x4a   :  { %2597 = vsyncadd [#allocation9], 4294959104  ;;  %v3445_v0 = vmov 0.0   ;;  %v166_v1 = vld [vmem:[#allocation7 + $0x18] sm:$0xff]  ;;  %v165_v3 = vld [vmem:[#allocation7 + $0x10] sm:$0xff] }
  0x4b   :  { %452 = vmatprep.mubr.f32.mxu1 %v3445_v0  ;;  %291 = vmatprep.mubr.f32.mxu0 %v3445_v0  ;;  %v170_v2 = vld [vmem:[#allocation7 + $0x38] sm:$0xff]  ;;  %v169_v5 = vld [vmem:[#allocation7 + $0x30] sm:$0xff]  ;;  %v2710_v49 = vld [vmem:[#allocation5] sm:$0xff] }
  0x4c   :  { %v2180_v4 = vpack.c.bf16 %v170_v2, %v166_v1  ;;  %v174_v6 = vld [vmem:[#allocation7 + $0x58] sm:$0xff]  ;;  %v2182_v8 = vpack.c.bf16 %v169_v5, %v165_v3  ;;  %v173_v10 = vld [vmem:[#allocation7 + $0x50] sm:$0xff]  ;;  %v2714_v50 = vld [vmem:[#allocation5 + $0x8] sm:$0xff]  ;;  %v2609_v2 = vmov 0  }
  0x4d   :  { %v178_v7 = vld [vmem:[#allocation7 + $0x78] sm:$0xff]  ;;  %v177_v11 = vld [vmem:[#allocation7 + $0x70] sm:$0xff]  ;;  %v2726_v53 = vld [vmem:[#allocation5 + $0x20] sm:$0xff]  ;;  %2352 = vset.pattern.permute.xlu0 %v2609_v2  ;;  %2353 = vset.pattern.permute.xlu1 %v2609_v2 }
  0x4e   :  { %v2184_v9 = vpack.c.bf16 %v178_v7, %v174_v6  ;;  %v182_v12 = vld [vmem:[#allocation7 + $0x98] sm:$0xff]  ;;  %2181 = vmatprep.subr.bf16.mxu1 %v2180_v4  ;;  %v2186_v14 = vpack.c.bf16 %v177_v11, %v173_v10  ;;  %v181_v16 = vld [vmem:[#allocation7 + $0x90] sm:$0xff]  ;;  %v2730_v54 = vld [vmem:[#allocation5 + $0x28] sm:$0xff] }
  0x4f   :  { %v186_v13 = vld [vmem:[#allocation7 + $0xb8] sm:$0xff]  ;;  %2183 = vmatpush1.bf16.msra.mxu1 %v2182_v8  ;;  %v185_v17 = vld [vmem:[#allocation7 + $0xb0] sm:$0xff]  ;;  %v2742_v57 = vld [vmem:[#allocation5 + $0x40] sm:$0xff] }
  0x50   :  { %2185 = vmatprep.subr.bf16.mxu1 %v2184_v9  ;;  %v2188_v15 = vpack.c.bf16 %v186_v13, %v182_v12  ;;  %v190_v18 = vld [vmem:[#allocation7 + $0xd8] sm:$0xff]  ;;  %v2190_v20 = vpack.c.bf16 %v185_v17, %v181_v16  ;;  %v189_v22 = vld [vmem:[#allocation7 + $0xd0] sm:$0xff]  ;;  %v2746_v58 = vld [vmem:[#allocation5 + $0x48] sm:$0xff] }
  0x51   :  { %v194_v19 = vld [vmem:[#allocation7 + $0xf8] sm:$0xff]  ;;  %v193_v23 = vld [vmem:[#allocation7 + $0xf0] sm:$0xff]  ;;  %v2758_v61 = vld [vmem:[#allocation5 + $0x60] sm:$0xff] }
  0x52   :  { %v2192_v21 = vpack.c.bf16 %v194_v19, %v190_v18  ;;  %v198_v24 = vld [vmem:[#allocation7 + $0x118] sm:$0xff]  ;;  %v2194_v26 = vpack.c.bf16 %v193_v23, %v189_v22  ;;  %v197_v28 = vld [vmem:[#allocation7 + $0x110] sm:$0xff]  ;;  %v2762_v62 = vld [vmem:[#allocation5 + $0x68] sm:$0xff] }
  0x53   :  { %2187 = vmatpush1.bf16.msra.mxu1 %v2186_v14  ;;  %v202_v25 = vld [vmem:[#allocation7 + $0x138] sm:$0xff]  ;;  %v201_v29 = vld [vmem:[#allocation7 + $0x130] sm:$0xff] }
  0x54   :  { %2189 = vmatprep.subr.bf16.mxu1 %v2188_v15  ;;  %v2196_v27 = vpack.c.bf16 %v202_v25, %v198_v24  ;;  %v206_v30 = vld [vmem:[#allocation7 + $0x158] sm:$0xff]  ;;  %v2198_v32 = vpack.c.bf16 %v201_v29, %v197_v28  ;;  %v205_v34 = vld [vmem:[#allocation7 + $0x150] sm:$0xff] }
  0x55   :  { %v210_v31 = vld [vmem:[#allocation7 + $0x178] sm:$0xff]  ;;  %v209_v35 = vld [vmem:[#allocation7 + $0x170] sm:$0xff] }
  0x56   :  { %v2200_v33 = vpack.c.bf16 %v210_v31, %v206_v30  ;;  %v214_v36 = vld [vmem:[#allocation7 + $0x198] sm:$0xff]  ;;  %v2202_v38 = vpack.c.bf16 %v209_v35, %v205_v34  ;;  %v213_v40 = vld [vmem:[#allocation7 + $0x190] sm:$0xff]  ;;  %v164_v35 = vld [vmem:[#allocation7 + $0x8] sm:$0xff] }
  0x57   :  { %2191 = vmatpush1.bf16.msra.mxu1 %v2190_v20  ;;  %v218_v37 = vld [vmem:[#allocation7 + $0x1b8] sm:$0xff]  ;;  %v217_v41 = vld [vmem:[#allocation7 + $0x1b0] sm:$0xff] }
  0x58   :  { %2193 = vmatprep.subr.bf16.mxu1 %v2192_v21  ;;  %v2204_v39 = vpack.c.bf16 %v218_v37, %v214_v36  ;;  %v222_v42 = vld [vmem:[#allocation7 + $0x1d8] sm:$0xff]  ;;  %v2206_v44 = vpack.c.bf16 %v217_v41, %v213_v40  ;;  %v221_v46 = vld [vmem:[#allocation7 + $0x1d0] sm:$0xff]  ;;  %v168_v36 = vld [vmem:[#allocation7 + $0x28] sm:$0xff] }
  0x59   :  { %v226_v43 = vld [vmem:[#allocation7 + $0x1f8] sm:$0xff]  ;;  %v225_v47 = vld [vmem:[#allocation7 + $0x1f0] sm:$0xff]  ;;  %v163_v37 = vld [vmem:[#allocation7] sm:$0xff] }
  0x5a   :  { %v2208_v45 = vpack.c.bf16 %v226_v43, %v222_v42  ;;  %v2210_v48 = vpack.c.bf16 %v225_v47, %v221_v46  ;;  %v2718_v51 = vld [vmem:[#allocation5 + $0x10] sm:$0xff]  ;;  %v2722_v52 = vld [vmem:[#allocation5 + $0x18] sm:$0xff]  ;;  %v172_v40 = vld [vmem:[#allocation7 + $0x48] sm:$0xff] }
  0x5b   :  { %2195 = vmatpush1.bf16.msra.mxu1 %v2194_v26  ;;  %v2734_v55 = vld [vmem:[#allocation5 + $0x30] sm:$0xff]  ;;  %v2738_v56 = vld [vmem:[#allocation5 + $0x38] sm:$0xff]  ;;  %v176_v41 = vld [vmem:[#allocation7 + $0x68] sm:$0xff] }
  0x5c   :  { %2197 = vmatprep.subr.bf16.mxu1 %v2196_v27  ;;  %v2750_v59 = vld [vmem:[#allocation5 + $0x50] sm:$0xff]  ;;  %v2754_v60 = vld [vmem:[#allocation5 + $0x58] sm:$0xff]  ;;  %v2152_v43 = vpack.c.bf16 %v176_v41, %v172_v40  ;;  %v180_v46 = vld [vmem:[#allocation7 + $0x88] sm:$0xff] }
  0x5d   :  { %v2766_v63 = vld [vmem:[#allocation5 + $0x70] sm:$0xff]  ;;  %v2770_v1 = vld [vmem:[#allocation5 + $0x78] sm:$0xff]  ;;  %v224_v40 = vld [vmem:[#allocation7 + $0x1e8] sm:$0xff] }
  0x5f   :  { %2199 = vmatpush1.bf16.msra.mxu1 %v2198_v32 }
  0x60   :  { %2201 = vmatprep.subr.bf16.mxu1 %v2200_v33 }
  0x63   :  { %2203 = vmatpush1.bf16.msra.mxu1 %v2202_v38  ;;  %v2148_v38 = vpack.c.bf16 %v168_v36, %v164_v35  ;;  %v216_v35 = vld [vmem:[#allocation7 + $0x1a8] sm:$0xff] }
  0x64   :  { %2205 = vmatprep.subr.bf16.mxu1 %v2204_v39  ;;  %v167_v39 = vld [vmem:[#allocation7 + $0x20] sm:$0xff] }
  0x65   :  { %v2150_v42 = vpack.c.bf16 %v167_v39, %v163_v37  ;;  %2149 = vmatprep.subr.bf16.mxu0 %v2148_v38  ;;  %v211_v37 = vld [vmem:[#allocation7 + $0x180] sm:$0xff]  ;;  %v220_v39 = vld [vmem:[#allocation7 + $0x1c8] sm:$0xff] }
  0x66   :  { %v215_v38 = vld [vmem:[#allocation7 + $0x1a0] sm:$0xff]  ;;  %v2176_v41 = vpack.c.bf16 %v224_v40, %v220_v39 }
  0x67   :  { %2207 = vmatpush1.bf16.msra.mxu1 %v2206_v44  ;;  %v171_v44 = vld [vmem:[#allocation7 + $0x40] sm:$0xff]  ;;  %2151 = vmatpush1.bf16.msra.mxu0 %v2150_v42 }
  0x68   :  { %2209 = vmatprep.subr.bf16.mxu1 %v2208_v45  ;;  %v175_v45 = vld [vmem:[#allocation7 + $0x60] sm:$0xff]  ;;  %2153 = vmatprep.subr.bf16.mxu0 %v2152_v43 }
  0x69   :  { %v2154_v47 = vpack.c.bf16 %v175_v45, %v171_v44  ;;  %v219_v42 = vld [vmem:[#allocation7 + $0x1c0] sm:$0xff] }
  0x6a   :  { %v223_v43 = vld [vmem:[#allocation7 + $0x1e0] sm:$0xff] }
  0x6b   :  { %2211 = vmatpush1.bf16.msra.mxu1 %v2210_v48  ;;  %v184_v48 = vld [vmem:[#allocation7 + $0xa8] sm:$0xff]  ;;  %2155 = vmatpush1.bf16.msra.mxu0 %v2154_v47 }
  0x6c   :  { %v2156_v2 = vpack.c.bf16 %v184_v48, %v180_v46  ;;  %v2610_v48 = vmov -1e+30  }
  0x6e   :  { %453 = vmatmul.mubr.f32.vlgmr.msra.gmra.mrb[0].mxu1 %v2710_v49  ;;  %2157 = vmatprep.subr.bf16.mxu0 %v2156_v2 }
  0x6f   :  { %458 = vmatprep.mubr.f32.mxu1 %v3445_v0 }
  0x72   :  { %459 = vmatmul.mubr.f32.gmra.mrb[2].mxu1 %v2714_v50 }
  0x73   :  { %464 = vmatprep.mubr.f32.mxu1 %v3445_v0 }
  0x76   :  { %465 = vmatmul.mubr.f32.gmra.mrb[4].mxu1 %v2718_v51 }
  0x77   :  { %470 = vmatprep.mubr.f32.mxu1 %v3445_v0 }
  0x7a   :  { %471 = vmatmul.mubr.f32.gmra.mrb[6].mxu1 %v2722_v52 }
  0x7b   :  { %476 = vmatprep.mubr.f32.mxu1 %v3445_v0 }
  0x7e   :  { %477 = vmatmul.mubr.f32.gmra.mrb[8].mxu1 %v2726_v53 }
  0x7f   :  { %482 = vmatprep.mubr.f32.mxu1 %v3445_v0 }
  0x82   :  { %483 = vmatmul.mubr.f32.gmra.mrb[10].mxu1 %v2730_v54 }
  0x83   :  { %488 = vmatprep.mubr.f32.mxu1 %v3445_v0 }
  0x86   :  { %489 = vmatmul.mubr.f32.gmra.mrb[12].mxu1 %v2734_v55 }
  0x87   :  { %494 = vmatprep.mubr.f32.mxu1 %v3445_v0 }
  0x8a   :  { %495 = vmatmul.mubr.f32.gmra.mrb[14].mxu1 %v2738_v56 }
  0x8b   :  { %500 = vmatprep.mubr.f32.mxu1 %v3445_v0 }
  0x8e   :  { %501 = vmatmul.mubr.f32.gmra.mrb[16].mxu1 %v2742_v57 }
  0x8f   :  { %506 = vmatprep.mubr.f32.mxu1 %v3445_v0 }
  0x92   :  { %507 = vmatmul.mubr.f32.gmra.mrb[18].mxu1 %v2746_v58 }
  0x93   :  { %512 = vmatprep.mubr.f32.mxu1 %v3445_v0 }
  0x96   :  { %513 = vmatmul.mubr.f32.gmra.mrb[20].mxu1 %v2750_v59 }
  0x97   :  { %518 = vmatprep.mubr.f32.mxu1 %v3445_v0 }
  0x9a   :  { %519 = vmatmul.mubr.f32.gmra.mrb[22].mxu1 %v2754_v60 }
  0x9b   :  { %524 = vmatprep.mubr.f32.mxu1 %v3445_v0 }
  0x9e   :  { %525 = vmatmul.mubr.f32.gmra.mrb[24].mxu1 %v2758_v61 }
  0x9f   :  { %530 = vmatprep.mubr.f32.mxu1 %v3445_v0 }
  0xa2   :  { %531 = vmatmul.mubr.f32.gmra.mrb[26].mxu1 %v2762_v62 }
  0xa3   :  { %536 = vmatprep.mubr.f32.mxu1 %v3445_v0 }
  0xa6   :  { %537 = vmatmul.mubr.f32.gmra.mrb[28].mxu1 %v2766_v63 }
  0xa7   :  { %542 = vmatprep.mubr.f32.mxu1 %v3445_v0 }
  0xaa   :  { %543 = vmatmul.mubr.f32.gmra.mrb[30].mxu1 %v2770_v1 }
  0xab   :  { %1185 = vmatprep.mubr.f32.mxu1 %v3445_v0 }
 0x141   :  { %v454_v3 = vpop.f32.mrb[0].mxu1 }
 0x142   :  { %v456_v4 = vpop.f32.mrb[1].mxu1 }
 0x143   :  { %583 = vperm.xlu0 %2352, %v456_v4   ;;  %v183_v4 = vld [vmem:[#allocation7 + $0xa0] sm:$0xff] }
 0x145   :  { %v460_v5 = vpop.f32.mrb[2].mxu1 }
 0x146   :  { %v462_v6 = vpop.f32.mrb[3].mxu1 }
 0x147   :  { %588 = vperm.xlu0 %2352, %v462_v6  }
 0x149   :  { %v466_v7 = vpop.f32.mrb[4].mxu1 }
 0x14a   :  { %v468_v8 = vpop.f32.mrb[5].mxu1 }
 0x14b   :  { %593 = vperm.xlu1 %2353, %v468_v8  }
 0x14d   :  { %v472_v9 = vpop.f32.mrb[6].mxu1 }
 0x14e   :  { %v474_v10 = vpop.f32.mrb[7].mxu1 }
 0x14f   :  { %598 = vperm.xlu1 %2353, %v474_v10   ;;  %v187_v10 = vld [vmem:[#allocation7 + $0xc0] sm:$0xff] }
 0x151   :  { %v478_v11 = vpop.f32.mrb[8].mxu1 }
 0x152   :  { %v480_v12 = vpop.f32.mrb[9].mxu1 }
 0x153   :  { %603 = vperm.xlu0 %2352, %v480_v12   ;;  %v191_v12 = vld [vmem:[#allocation7 + $0xe0] sm:$0xff] }
 0x155   :  { %v2774_v13 = vpop.f32.mrb[10].mxu1 }
 0x156   :  { %v486_v14 = vpop.f32.mrb[11].mxu1 }
 0x157   :  { %608 = vperm.xlu1 %2353, %v486_v14   ;;  %v196_v14 = vld [vmem:[#allocation7 + $0x108] sm:$0xff] }
 0x159   :  { %v2776_v15 = vpop.f32.mrb[12].mxu1 }
 0x15a   :  { %v492_v16 = vpop.f32.mrb[13].mxu1 }
 0x15b   :  { %613 = vperm.xlu0 %2352, %v492_v16   ;;  %v200_v16 = vld [vmem:[#allocation7 + $0x128] sm:$0xff] }
 0x15d   :  { %v2778_v17 = vpop.f32.mrb[14].mxu1 }
 0x15e   :  { %v498_v18 = vpop.f32.mrb[15].mxu1 }
 0x15f   :  { %618 = vperm.xlu1 %2353, %v498_v18   ;;  %v2164_v18 = vpack.c.bf16 %v200_v16, %v196_v14 }
 0x161   :  { %v2780_v19 = vpop.f32.mrb[16].mxu1 }
 0x162   :  { %v504_v20 = vpop.f32.mrb[17].mxu1 }
 0x163   :  { %623 = vperm.xlu1 %2353, %v504_v20   ;;  %v195_v20 = vld [vmem:[#allocation7 + $0x100] sm:$0xff] }
 0x165   :  { %v2782_v21 = vpop.f32.mrb[18].mxu1 }
 0x166   :  { %v510_v22 = vpop.f32.mrb[19].mxu1 }
 0x167   :  { %628 = vperm.xlu1 %2353, %v510_v22   ;;  %v199_v22 = vld [vmem:[#allocation7 + $0x120] sm:$0xff] }
 0x169   :  { %v2784_v23 = vpop.f32.mrb[20].mxu1 }
 0x16a   :  { %v516_v24 = vpop.f32.mrb[21].mxu1 }
 0x16b   :  { %633 = vperm.xlu1 %2353, %v516_v24   ;;  %v204_v24 = vld [vmem:[#allocation7 + $0x148] sm:$0xff] }
 0x16d   :  { %v2786_v25 = vpop.f32.mrb[22].mxu1 }
 0x16e   :  { %v522_v26 = vpop.f32.mrb[23].mxu1 }
 0x16f   :  { %638 = vperm.xlu1 %2353, %v522_v26   ;;  %v208_v26 = vld [vmem:[#allocation7 + $0x168] sm:$0xff] }
 0x171   :  { %v2788_v27 = vpop.f32.mrb[24].mxu1 }
 0x172   :  { %v528_v28 = vpop.f32.mrb[25].mxu1 }
 0x173   :  { %643 = vperm.xlu1 %2353, %v528_v28   ;;  %v2168_v28 = vpack.c.bf16 %v208_v26, %v204_v24 }
 0x175   :  { %v2790_v29 = vpop.f32.mrb[26].mxu1 }
 0x176   :  { %v534_v30 = vpop.f32.mrb[27].mxu1 }
 0x177   :  { %648 = vperm.xlu1 %2353, %v534_v30   ;;  %v203_v30 = vld [vmem:[#allocation7 + $0x140] sm:$0xff] }
 0x179   :  { %549 = vxpose.xlu0.b32.start [1/16] (narrow) %v454_v3, 8  ;;  %v2792_v31 = vpop.f32.mrb[28].mxu1  ;;  %v179_v3 = vld [vmem:[#allocation7 + $0x80] sm:$0xff] }
 0x17a   :  { %v540_v32 = vpop.f32.mrb[29].mxu1  ;;  %v2158_v6 = vpack.c.bf16 %v183_v4, %v179_v3 }
 0x17b   :  { %653 = vperm.xlu1 %2353, %v540_v32   ;;  %v207_v32 = vld [vmem:[#allocation7 + $0x160] sm:$0xff] }
 0x17c   :  { %2159 = vmatpush1.bf16.msra.mxu0 %v2158_v6 }
 0x17d   :  { %550 = vxpose.xlu0.b32.cont [2/16] (narrow) %v460_v5, 8  ;;  %v2794_v33 = vpop.f32.mrb[30].mxu1  ;;  %v188_v5 = vld [vmem:[#allocation7 + $0xc8] sm:$0xff] }
 0x17e   :  { %v546_v34 = vpop.f32.mrb[31].mxu1 }
 0x17f   :  { %658 = vperm.xlu1 %2353, %v546_v34   ;;  %v212_v34 = vld [vmem:[#allocation7 + $0x188] sm:$0xff] }
 0x180   :  { %v2172_v36 = vpack.c.bf16 %v216_v35, %v212_v34 }
 0x181   :  { %551 = vxpose.xlu0.b32.cont [3/16] (narrow) %v466_v7, 8  ;;  %v192_v7 = vld [vmem:[#allocation7 + $0xe8] sm:$0xff] }
 0x182   :  { %v2160_v8 = vpack.c.bf16 %v192_v7, %v188_v5 }
 0x184   :  { %2161 = vmatprep.subr.bf16.mxu0 %v2160_v8 }
 0x185   :  { %552 = vxpose.xlu0.b32.cont [4/16] (narrow) %v472_v9, 8  ;;  %v2162_v9 = vpack.c.bf16 %v191_v12, %v187_v10 }
 0x187   :  { %2163 = vmatpush1.bf16.msra.mxu0 %v2162_v9 }
 0x188   :  { %2165 = vmatprep.subr.bf16.mxu0 %v2164_v18 }
 0x189   :  { %553 = vxpose.xlu0.b32.cont [5/16] (narrow) %v478_v11, 8  ;;  %v2166_v11 = vpack.c.bf16 %v199_v22, %v195_v20 }
 0x18b   :  { %2167 = vmatpush1.bf16.msra.mxu0 %v2166_v11 }
 0x18c   :  { %2169 = vmatprep.subr.bf16.mxu0 %v2168_v28 }
 0x18d   :  { %554 = vxpose.xlu0.b32.cont [6/16] (narrow) %v2774_v13, 8  ;;  %v2170_v13 = vpack.c.bf16 %v207_v32, %v203_v30 }
 0x18f   :  { %2171 = vmatpush1.bf16.msra.mxu0 %v2170_v13 }
 0x190   :  { %2173 = vmatprep.subr.bf16.mxu0 %v2172_v36 }
 0x191   :  { %555 = vxpose.xlu0.b32.cont [7/16] (narrow) %v2776_v15, 8  ;;  %v2174_v15 = vpack.c.bf16 %v215_v38, %v211_v37 }
 0x193   :  { %2175 = vmatpush1.bf16.msra.mxu0 %v2174_v15 }
 0x194   :  { %2177 = vmatprep.subr.bf16.mxu0 %v2176_v41 }
 0x195   :  { %556 = vxpose.xlu0.b32.cont [8/16] (narrow) %v2778_v17, 8  ;;  %v2178_v17 = vpack.c.bf16 %v223_v43, %v219_v42  ;;  %v81_v43 = vld [vmem:[#allocation2 + $0x10] sm:$0xff] }
 0x197   :  { %2179 = vmatpush1.bf16.msra.mxu0 %v2178_v17 }
 0x199   :  { %557 = vxpose.xlu0.b32.cont [9/16] (narrow) %v2780_v19, 8 }
 0x19a   :  { %292 = vmatmul.mubr.f32.vlgmr.msra.gmra.mrb[0].mxu0 %v2710_v49 }
 0x19b   :  { %297 = vmatprep.mubr.f32.mxu0 %v3445_v0 }
 0x19d   :  { %558 = vxpose.xlu0.b32.cont [10/16] (narrow) %v2782_v21, 8 }
 0x19e   :  { %298 = vmatmul.mubr.f32.gmra.mrb[2].mxu0 %v2714_v50 }
 0x19f   :  { %303 = vmatprep.mubr.f32.mxu0 %v3445_v0 }
 0x1a1   :  { %559 = vxpose.xlu0.b32.cont [11/16] (narrow) %v2784_v23, 8 }
 0x1a2   :  { %304 = vmatmul.mubr.f32.gmra.mrb[4].mxu0 %v2718_v51 }
 0x1a3   :  { %309 = vmatprep.mubr.f32.mxu0 %v3445_v0 }
 0x1a5   :  { %560 = vxpose.xlu0.b32.cont [12/16] (narrow) %v2786_v25, 8 }
 0x1a6   :  { %310 = vmatmul.mubr.f32.gmra.mrb[6].mxu0 %v2722_v52  ;;  %v661_v52 = vlaneseq }
 0x1a7   :  { %315 = vmatprep.mubr.f32.mxu0 %v3445_v0 }
 0x1a9   :  { %561 = vxpose.xlu0.b32.cont [13/16] (narrow) %v2788_v27, 8 }
 0x1aa   :  { %316 = vmatmul.mubr.f32.gmra.mrb[8].mxu0 %v2726_v53  ;;  %v2838_v53 = vld [vmem:[#allocation2 + $0x8] sm:$0xff] }
 0x1ab   :  { %321 = vmatprep.mubr.f32.mxu0 %v3445_v0  ;;  %v87_v24 = vunpack.c.0.s8 %v2838_v53  ;;  %v88_v35 = vunpack.c.1.s8 %v2838_v53  ;;  %v89_v41 = vunpack.c.2.s8 %v2838_v53 }
 0x1ad   :  { %562 = vxpose.xlu0.b32.cont [14/16] (narrow) %v2790_v29, 8  ;;  %v103_v13 = vcvt.s32.f32 %v87_v24  ;;  %v104_v40 = vcvt.s32.f32 %v88_v35 }
 0x1ae   :  { %322 = vmatmul.mubr.f32.gmra.mrb[10].mxu0 %v2730_v54 }
 0x1af   :  { %327 = vmatprep.mubr.f32.mxu0 %v3445_v0  ;;  %vm119_vm5 = vcmp.gt.f32.partialorder %v103_v13, 0.0  ;;  %vm120_vm6 = vcmp.gt.f32.partialorder %v104_v40, 0.0 }
 0x1b1   :  { %563 = vxpose.xlu0.b32.cont [15/16] (narrow) %v2792_v31, 8 }
 0x1b2   :  { %328 = vmatmul.mubr.f32.gmra.mrb[12].mxu0 %v2734_v55  ;;  %v79_v55 = vld [vmem:[#allocation2] sm:$0xff] }
 0x1b3   :  { %333 = vmatprep.mubr.f32.mxu0 %v3445_v0  ;;  %v85_v29 = vunpack.c.2.s8 %v79_v55  ;;  %v86_v5 = vunpack.c.3.s8 %v79_v55 }
 0x1b5   :  { %564 = vxpose.xlu0.b32.end [16/16] (narrow) %v2794_v33, 8  ;;  %v101_v8 = vcvt.s32.f32 %v85_v29  ;;  %v102_v22 = vcvt.s32.f32 %v86_v5 }
 0x1b6   :  { %334 = vmatmul.mubr.f32.gmra.mrb[14].mxu0 %v2738_v56  ;;  %v2840_v56 = vshrl.u32 %v661_v52, 7  ;;  %v2897_v52 = vsel %vm119_vm5, 0.0, %v2610_v48 }
 0x1b7   :  { %339 = vmatprep.mubr.f32.mxu0 %v3445_v0  ;;  %vm117_vm3 = vcmp.gt.f32.partialorder %v101_v8, 0.0  ;;  %vm118_vm4 = vcmp.gt.f32.partialorder %v102_v22, 0.0  ;;  %v82_v8 = vld [vmem:[#allocation2 + $0x18] sm:$0xff] }
 0x1b8   :  { %v2878_v34 = vsel %vm117_vm3, 0.0, %v2610_v48  ;;  %v2887_v15 = vsel %vm118_vm4, 0.0, %v2610_v48 }
 0x1ba   :  { %340 = vmatmul.mubr.f32.gmra.mrb[16].mxu0 %v2742_v57 }
 0x1bb   :  { %345 = vmatprep.mubr.f32.mxu0 %v3445_v0 }
 0x1be   :  { %346 = vmatmul.mubr.f32.gmra.mrb[18].mxu0 %v2746_v58  ;;  %v90_v58 = vunpack.c.3.s8 %v2838_v53 }
 0x1bf   :  { %351 = vmatprep.mubr.f32.mxu0 %v3445_v0 }
 0x1c2   :  { %352 = vmatmul.mubr.f32.gmra.mrb[20].mxu0 %v2750_v59  ;;  %v584_v49 = vpop.permute.xlu0 %583  ;;  %v83_v59 = vunpack.c.0.s8 %v79_v55 }
 0x1c3   :  { %357 = vmatprep.mubr.f32.mxu0 %v3445_v0 }
 0x1c4   :  { %v99_v19 = vcvt.s32.f32 %v83_v59 }
 0x1c6   :  { %358 = vmatmul.mubr.f32.gmra.mrb[22].mxu0 %v2754_v60  ;;  %v589_v50 = vpop.permute.xlu0 %588  ;;  %vm115_vm1 = vcmp.gt.f32.partialorder %v99_v19, 0.0 }
 0x1c7   :  { %363 = vmatprep.mubr.f32.mxu0 %v3445_v0  ;;  %v2858_v3 = vsel %vm115_vm1, 0.0, %v2610_v48 }
 0x1ca   :  { %364 = vmatmul.mubr.f32.gmra.mrb[24].mxu0 %v2758_v61  ;;  %v594_v51 = vpop.permute.xlu1 %593  ;;  %v3444_v61 = vsub.s32 0, %v2840_v56 }
 0x1cb   :  { %369 = vmatprep.mubr.f32.mxu0 %v3445_v0 }
 0x1ce   :  { %370 = vmatmul.mubr.f32.gmra.mrb[26].mxu0 %v2762_v62  ;;  %v599_v57 = vpop.permute.xlu1 %598 }
 0x1cf   :  { %375 = vmatprep.mubr.f32.mxu0 %v3445_v0 }
 0x1d2   :  { %376 = vmatmul.mubr.f32.gmra.mrb[28].mxu0 %v2766_v63  ;;  %v604_v54 = vpop.permute.xlu0 %603  ;;  %v106_v63 = vcvt.s32.f32 %v90_v58 }
 0x1d3   :  { %381 = vmatprep.mubr.f32.mxu0 %v3445_v0 }
 0x1d4   :  { %vm122_vm0 = vcmp.gt.f32.partialorder %v106_v63, 0.0  ;;  %v2905_v63 = vsel %vm120_vm6, 0.0, %v2610_v48 }
 0x1d5   :  { %v2855_v2 = vsel %vm122_vm0, 0.0, %v2610_v48 }
 0x1d6   :  { %382 = vmatmul.mubr.f32.gmra.mrb[30].mxu0 %v2770_v1  ;;  %v609_v62 = vpop.permute.xlu1 %608  ;;  %v84_v1 = vunpack.c.1.s8 %v79_v55  ;;  %v91_v55 = vunpack.c.0.s8 %v81_v43 }
 0x1d8   :  { %v100_v27 = vcvt.s32.f32 %v84_v1  ;;  %v92_v1 = vunpack.c.1.s8 %v81_v43 }
 0x1da   :  { %v2843_v60 = vpop.permute.xlu0 %613  ;;  %vm116_vm2 = vcmp.gt.f32.partialorder %v100_v27, 0.0 }
 0x1db   :  { %v2868_v20 = vsel %vm116_vm2, 0.0, %v2610_v48 }
 0x1de   :  { %v619_v25 = vpop.permute.xlu1 %618 }
 0x1e2   :  { %v624_v10 = vpop.permute.xlu1 %623 }
 0x1e6   :  { %v629_v32 = vpop.permute.xlu1 %628 }
 0x1ea   :  { %v634_v42 = vpop.permute.xlu1 %633 }
 0x1f9   :  { %v565_v21 = vpop.trf.xlu0 }
 0x1fa   :  { %v2848_v23 = vrot.slane %v565_v21, %v3444_v61  ;;  %v1069_v61 = vld [vmem:[#allocation8 + $0x60] sm:$0xff] }
 0x1fc   :  { %v672_v31 = vadd.f32 %v2848_v23, %v619_v25  ;;  %v665_v33 = vadd.f32 %v2848_v23, %v584_v49  ;;  %v666_v44 = vadd.f32 %v2848_v23, %v589_v50  ;;  %v667_v47 = vadd.f32 %v2848_v23, %v594_v51 }
 0x1fd   :  { %v668_v12 = vadd.f32 %v2848_v23, %v599_v57  ;;  %v669_v30 = vadd.f32 %v2848_v23, %v604_v54  ;;  %v670_v39 = vadd.f32 %v2848_v23, %v609_v62  ;;  %v671_v51 = vadd.f32 %v2848_v23, %v2843_v60  ;;  %v639_v62 = vpop.permute.xlu1 %638 }
 0x1fe   :  { %v688_v45 = vmul.f32 0.2, %v672_v31  ;;  %v681_v46 = vmul.f32 0.2, %v665_v33  ;;  %v682_v4 = vmul.f32 0.2, %v666_v44  ;;  %v105_v54 = vcvt.s32.f32 %v89_v41 }
 0x1ff   :  { %v683_v18 = vmul.f32 0.2, %v667_v47  ;;  %v684_v28 = vmul.f32 0.2, %v668_v12  ;;  %v685_v38 = vmul.f32 0.2, %v669_v30  ;;  %v673_v59 = vadd.f32 %v2848_v23, %v624_v10 }
 0x200   :  { %v704_v6 = vmax.f32 %v672_v31, %v688_v45  ;;  %v697_v7 = vmax.f32 %v665_v33, %v681_v46  ;;  %v698_v16 = vmax.f32 %v666_v44, %v682_v4  ;;  %v686_v50 = vmul.f32 0.2, %v670_v39 }
 0x201   :  { %v699_v26 = vmax.f32 %v667_v47, %v683_v18  ;;  %v700_v37 = vmax.f32 %v668_v12, %v684_v28  ;;  %v701_v49 = vmax.f32 %v669_v30, %v685_v38  ;;  %v687_v58 = vmul.f32 0.2, %v671_v51  ;;  %v644_v44 = vpop.permute.xlu1 %643 }
 0x202   :  { %v2862_v14 = vadd.f32 %v704_v6, %v2855_v2  ;;  %v2865_v9 = vadd.f32 %v697_v7, %v2858_v3  ;;  %v2874_v11 = vadd.f32 %v698_v16, %v2868_v20  ;;  %v702_v57 = vmax.f32 %v670_v39, %v686_v50 }
 0x203   :  { %v2883_v36 = vadd.f32 %v699_v26, %v2878_v34  ;;  %v2892_v17 = vadd.f32 %v700_v37, %v2887_v15  ;;  %v2901_v53 = vadd.f32 %v701_v49, %v2897_v52  ;;  %vm121_vm7 = vcmp.gt.f32.partialorder %v105_v54, 0.0 }
 0x204   :  { %743 = vmax.xlane.f32.xlu0 %v2862_v14  ;;  %729 = vmax.xlane.f32.xlu1 %v2865_v9  ;;  %v107_v60 = vcvt.s32.f32 %v91_v55  ;;  %v2909_v19 = vadd.f32 %v702_v57, %v2905_v63  ;;  %v703_v21 = vmax.f32 %v671_v51, %v687_v58  ;;  %v689_v25 = vmul.f32 0.2, %v673_v59 }
 0x205   :  { %v674_v27 = vadd.f32 %v2848_v23, %v629_v32  ;;  %v2913_v29 = vsel %vm121_vm7, 0.0, %v2610_v48  ;;  %v108_v31 = vcvt.s32.f32 %v92_v1  ;;  %v93_v33 = vunpack.c.2.s8 %v81_v43  ;;  %v649_v22 = vpop.permute.xlu1 %648 }
 0x206   :  { %vm123_vm8 = vcmp.gt.f32.partialorder %v107_v60, 0.0  ;;  %v2917_v45 = vadd.f32 %v703_v21, %v2913_v29  ;;  %v705_v46 = vmax.f32 %v673_v59, %v689_v25  ;;  %v675_v4 = vadd.f32 %v2848_v23, %v634_v42 }
 0x207   :  { %v690_v47 = vmul.f32 0.2, %v674_v27  ;;  %v2921_v5 = vsel %vm123_vm8, 0.0, %v2610_v48  ;;  %vm124_vm9 = vcmp.gt.f32.partialorder %v108_v31, 0.0  ;;  %v109_v6 = vcvt.s32.f32 %v93_v33 }
 0x208   :  { %731 = vmax.xlane.f32.xlu1 %v2874_v11  ;;  %v94_v7 = vunpack.c.3.s8 %v81_v43  ;;  %v2925_v10 = vadd.f32 %v705_v46, %v2921_v5  ;;  %v691_v16 = vmul.f32 0.2, %v675_v4  ;;  %v676_v18 = vadd.f32 %v2848_v23, %v639_v62 }
 0x209   :  { %v706_v12 = vmax.f32 %v674_v27, %v690_v47  ;;  %v2929_v24 = vsel %vm124_vm9, 0.0, %v2610_v48  ;;  %vm125_vm10 = vcmp.gt.f32.partialorder %v109_v6, 0.0  ;;  %v95_v28 = vunpack.c.0.s8 %v82_v8  ;;  %v654_v40 = vpop.permute.xlu1 %653 }
 0x20a   :  { %v110_v26 = vcvt.s32.f32 %v94_v7  ;;  %v707_v32 = vmax.f32 %v675_v4, %v691_v16  ;;  %v692_v13 = vmul.f32 0.2, %v676_v18  ;;  %v677_v35 = vadd.f32 %v2848_v23, %v644_v44 }
 0x20b   :  { %v2933_v30 = vadd.f32 %v706_v12, %v2929_v24  ;;  %v2937_v37 = vsel %vm125_vm10, 0.0, %v2610_v48  ;;  %v111_v38 = vcvt.s32.f32 %v95_v28  ;;  %v96_v39 = vunpack.c.1.s8 %v82_v8 }
 0x20c   :  { %733 = vmax.xlane.f32.xlu1 %v2883_v36  ;;  %vm126_vm11 = vcmp.gt.f32.partialorder %v110_v26, 0.0  ;;  %v2941_v41 = vadd.f32 %v707_v32, %v2937_v37  ;;  %v708_v42 = vmax.f32 %v676_v18, %v692_v13  ;;  %v693_v43 = vmul.f32 0.2, %v677_v35 }
 0x20d   :  { %v678_v49 = vadd.f32 %v2848_v23, %v649_v22  ;;  %v2945_v50 = vsel %vm126_vm11, 0.0, %v2610_v48  ;;  %vm127_vm12 = vcmp.gt.f32.partialorder %v111_v38, 0.0  ;;  %v112_v51 = vcvt.s32.f32 %v96_v39  ;;  %v659_v62 = vpop.permute.xlu1 %658 }
 0x20e   :  { %3451 = vst [vmem:[#allocation15_spill] sm:$0xff] %v2945_v50  ;;  %v97_v54 = vunpack.c.2.s8 %v82_v8  ;;  %v679_v55 = vadd.f32 %v2848_v23, %v654_v40  ;;  %v2950_v57 = vadd.f32 %v708_v42, %v2945_v50  ;;  %v709_v58 = vmax.f32 %v677_v35, %v693_v43  ;;  %v1073_v50 = vld [vmem:[#allocation8 + $0x80] sm:$0xff] }
 0x20f   :  { %v694_v59 = vmul.f32 0.2, %v678_v49  ;;  %v2953_v60 = vsel %vm127_vm12, 0.0, %v2610_v48  ;;  %vm128_vm13 = vcmp.gt.f32.partialorder %v112_v51, 0.0  ;;  %v98_v21 = vunpack.c.3.s8 %v82_v8 }
 0x210   :  { %735 = vmax.xlane.f32.xlu1 %v2892_v17  ;;  %3452 = vst [vmem:[#allocation16_spill] sm:$0xff] %v2953_v60  ;;  %v113_v1 = vcvt.s32.f32 %v97_v54  ;;  %v695_v25 = vmul.f32 0.2, %v679_v55  ;;  %v680_v27 = vadd.f32 %v2848_v23, %v659_v62  ;;  %v2958_v31 = vadd.f32 %v709_v58, %v2953_v60 }
 0x211   :  { %v710_v33 = vmax.f32 %v678_v49, %v694_v59  ;;  %v2961_v44 = vsel %vm128_vm13, 0.0, %v2610_v48  ;;  %v114_v46 = vcvt.s32.f32 %v98_v21 }
 0x212   :  { %vm129_vm14 = vcmp.gt.f32.partialorder %v113_v1, 0.0  ;;  %v696_v47 = vmul.f32 0.2, %v680_v27  ;;  %v711_v6 = vmax.f32 %v679_v55, %v695_v25 }
 0x213   :  { %v2965_v4 = vadd.f32 %v710_v33, %v2961_v44  ;;  %v2968_v7 = vsel %vm129_vm14, 0.0, %v2610_v48  ;;  %vm130_vm15 = vcmp.gt.f32.partialorder %v114_v46, 0.0 }
 0x214   :  { %737 = vmax.xlane.f32.xlu1 %v2901_v53  ;;  %3453 = vst [vmem:[#allocation17_spill] sm:$0xff] %v2968_v7  ;;  %v2972_v23 = vadd.f32 %v711_v6, %v2968_v7  ;;  %v712_v8 = vmax.f32 %v680_v27, %v696_v47  ;;  %v2975_v12 = vsel %vm130_vm15, 0.0, %v2610_v48  ;;  %v1078_v7 = vld [vmem:[#allocation8 + $0xa8] sm:$0xff] }
 0x215   :  { %3454 = vst [vmem:[#allocation18_spill] sm:$0xff] %v2975_v12 }
 0x216   :  { %v2979_v16 = vadd.f32 %v712_v8, %v2975_v12  ;;  %v1074_v12 = vld [vmem:[#allocation8 + $0x88] sm:$0xff] }
 0x217   :  { %v2252_v60 = vpack.c.bf16 %v1078_v7, %v1074_v12  ;;  %v1102_v7 = vld [vmem:[#allocation8 + $0x168] sm:$0xff] }
 0x218   :  { %739 = vmax.xlane.f32.xlu1 %v2909_v19 }
 0x21c   :  { %741 = vmax.xlane.f32.xlu1 %v2917_v45 }
 0x220   :  { %745 = vmax.xlane.f32.xlu1 %v2925_v10 }
 0x224   :  { %747 = vmax.xlane.f32.xlu1 %v2933_v30 }
 0x228   :  { %749 = vmax.xlane.f32.xlu1 %v2941_v41 }
 0x22c   :  { %751 = vmax.xlane.f32.xlu1 %v2950_v57 }
 0x230   :  { %753 = vmax.xlane.f32.xlu1 %v2958_v31 }
 0x234   :  { %755 = vmax.xlane.f32.xlu1 %v2965_v4 }
 0x238   :  { %757 = vmax.xlane.f32.xlu1 %v2972_v23 }
 0x23c   :  { %759 = vmax.xlane.f32.xlu1 %v2979_v16 }
 0x26d   :  { %v293_v18 = vpop.f32.mrb[0].mxu0 }
 0x26e   :  { %v2982_v22 = vpop.f32.mrb[1].mxu0 }
 0x271   :  { %v299_v26 = vpop.f32.mrb[2].mxu0 }
 0x272   :  { %v2212_v28 = vpack.c.bf16 %v299_v26, %v293_v18  ;;  %v2984_v32 = vpop.f32.mrb[3].mxu0 }
 0x274   :  { %2213 = vmatprep.subr.bf16.mxu0 %v2212_v28 }
 0x275   :  { %2215 = vmatpush3.bf16.msra.mxu0 %v2212_v28  ;;  %v305_v13 = vpop.f32.mrb[4].mxu0 }
 0x276   :  { %v2986_v35 = vpop.f32.mrb[5].mxu0 }
 0x279   :  { %v311_v48 = vpop.f32.mrb[6].mxu0 }
 0x27a   :  { %v2216_v38 = vpack.c.bf16 %v311_v48, %v305_v13  ;;  %v2988_v39 = vpop.f32.mrb[7].mxu0 }
 0x27c   :  { %2217 = vmatprep.subr.bf16.mxu0 %v2216_v38 }
 0x27d   :  { %2219 = vmatpush3.bf16.msra.mxu0 %v2216_v38  ;;  %v317_v40 = vpop.f32.mrb[8].mxu0 }
 0x27e   :  { %v2990_v42 = vpop.f32.mrb[9].mxu0 }
 0x281   :  { %v323_v43 = vpop.f32.mrb[10].mxu0 }
 0x282   :  { %v2220_v49 = vpack.c.bf16 %v323_v43, %v317_v40  ;;  %v2992_v51 = vpop.f32.mrb[11].mxu0 }
 0x284   :  { %2221 = vmatprep.subr.bf16.mxu0 %v2220_v49 }
 0x285   :  { %2223 = vmatpush3.bf16.msra.mxu0 %v2220_v49  ;;  %v329_v54 = vpop.f32.mrb[12].mxu0 }
 0x286   :  { %v2994_v55 = vpop.f32.mrb[13].mxu0 }
 0x289   :  { %v335_v62 = vpop.f32.mrb[14].mxu0 }
 0x28a   :  { %v2224_v21 = vpack.c.bf16 %v335_v62, %v329_v54  ;;  %v2997_v25 = vpop.f32.mrb[15].mxu0 }
 0x28c   :  { %2225 = vmatprep.subr.bf16.mxu0 %v2224_v21 }
 0x28d   :  { %2227 = vmatpush3.bf16.msra.mxu0 %v2224_v21  ;;  %v341_v46 = vpop.f32.mrb[16].mxu0 }
 0x28e   :  { %v3000_v6 = vpop.f32.mrb[17].mxu0 }
 0x291   :  { %v730_v58 = vpop.xlane.xlu1 %729 }
 0x292   :  { %v761_v59 = vsub.f32 %v2865_v9, %v730_v58  ;;  %v347_v9 = vpop.f32.mrb[18].mxu0  ;;  %v744_v58 = vpop.xlane.xlu0 %743 }
 0x293   :  { %v2228_v28 = vpack.c.bf16 %v347_v9, %v341_v46  ;;  %v3003_v13 = vpop.f32.mrb[19].mxu0 }
 0x294   :  { %v777_v1 = vmul.f32 1.442695, %v761_v59 }
 0x295   :  { %v732_v27 = vpop.xlane.xlu1 %731  ;;  %2229 = vmatprep.subr.bf16.mxu0 %v2228_v28  ;;  %v353_v38 = vpop.f32.mrb[20].mxu0 }
 0x296   :  { %v762_v33 = vsub.f32 %v2874_v11, %v732_v27  ;;  %2354 = vpow2.f32 %v777_v1  ;;  %2231 = vmatpush3.bf16.msra.mxu0 %v2228_v28  ;;  %v3006_v43 = vpop.f32.mrb[21].mxu0  ;;  %v768_v27 = vsub.f32 %v2862_v14, %v744_v58 }
 0x298   :  { %v779_v47 = vmul.f32 1.442695, %v762_v33  ;;  %v791_v9 = vmul.f32 1.442695, %v768_v27 }
 0x299   :  { %v734_v8 = vpop.xlane.xlu1 %733  ;;  %v359_v59 = vpop.f32.mrb[22].mxu0 }
 0x29a   :  { %2356 = vpow2.f32 %v779_v47  ;;  %v763_v18 = vsub.f32 %v2883_v36, %v734_v8  ;;  %v3014_v21 = vpop.f32.mrb[23].mxu0 }
 0x29c   :  { %v781_v26 = vmul.f32 1.442695, %v763_v18 }
 0x29d   :  { %v736_v48 = vpop.xlane.xlu1 %735  ;;  %v365_v47 = vpop.f32.mrb[24].mxu0 }
 0x29e   :  { %2358 = vpow2.f32 %v781_v26  ;;  %v764_v11 = vsub.f32 %v2892_v17, %v736_v48  ;;  %v2232_v17 = vpack.c.bf16 %v359_v59, %v353_v38  ;;  %v3021_v18 = vpop.f32.mrb[25].mxu0 }
 0x2a0   :  { %v783_v40 = vmul.f32 1.442695, %v764_v11  ;;  %v3008_v49 = vpop.eup %2354  ;;  %2233 = vmatprep.subr.bf16.mxu0 %v2232_v17 }
 0x2a1   :  { %v738_v54 = vpop.xlane.xlu1 %737  ;;  %809 = vadd.xlane.f32.xlu1 %v3008_v49  ;;  %2235 = vmatpush3.bf16.msra.mxu0 %v2232_v17  ;;  %v371_v28 = vpop.f32.mrb[26].mxu0 }
 0x2a2   :  { %2360 = vpow2.f32 %v783_v40  ;;  %v765_v36 = vsub.f32 %v2901_v53, %v738_v54  ;;  %v3027_v38 = vpop.f32.mrb[27].mxu0 }
 0x2a4   :  { %v3012_v62 = vpop.eup %2356  ;;  %v785_v1 = vmul.f32 1.442695, %v765_v36 }
 0x2a5   :  { %v740_v33 = vpop.xlane.xlu1 %739  ;;  %811 = vadd.xlane.f32.xlu1 %v3012_v62  ;;  %v377_v58 = vpop.f32.mrb[28].mxu0 }
 0x2a6   :  { %2362 = vpow2.f32 %v785_v1  ;;  %v766_v46 = vsub.f32 %v2909_v19, %v740_v33  ;;  %v2236_v19 = vpack.c.bf16 %v371_v28, %v365_v47  ;;  %v3033_v59 = vpop.f32.mrb[29].mxu0 }
 0x2a8   :  { %v3019_v8 = vpop.eup %2358  ;;  %v787_v53 = vmul.f32 1.442695, %v766_v46  ;;  %2237 = vmatprep.subr.bf16.mxu0 %v2236_v19 }
 0x2a9   :  { %v742_v26 = vpop.xlane.xlu1 %741  ;;  %813 = vadd.xlane.f32.xlu1 %v3019_v8  ;;  %2239 = vmatpush3.bf16.msra.mxu0 %v2236_v19  ;;  %v383_v27 = vpop.f32.mrb[30].mxu0 }
 0x2aa   :  { %2364 = vpow2.f32 %v787_v53  ;;  %v767_v14 = vsub.f32 %v2917_v45, %v742_v26  ;;  %v2240_v47 = vpack.c.bf16 %v383_v27, %v377_v58 }
 0x2ab   :  { %2366 = vpow2.f32 %v791_v9 }
 0x2ac   :  { %v3025_v48 = vpop.eup %2360  ;;  %v789_v11 = vmul.f32 1.442695, %v767_v14  ;;  %2241 = vmatprep.subr.bf16.mxu0 %v2240_v47 }
 0x2ad   :  { %815 = vadd.xlane.f32.xlu0 %v3025_v48  ;;  %v746_v40 = vpop.xlane.xlu1 %745  ;;  %2243 = vmatpush3.bf16.msra.mxu0 %v2240_v47 }
 0x2ae   :  { %2368 = vpow2.f32 %v789_v11  ;;  %v769_v54 = vsub.f32 %v2925_v10, %v746_v40 }
 0x2b0   :  { %v3031_v36 = vpop.eup %2362  ;;  %v793_v45 = vmul.f32 1.442695, %v769_v54  ;;  %v3052_v54 = vpop.f32.mrb[31].mxu0 }
 0x2b1   :  { %817 = vadd.xlane.f32.xlu1 %v3031_v36  ;;  %v748_v1 = vpop.xlane.xlu1 %747 }
 0x2b2   :  { %2370 = vpow2.f32 %v793_v45  ;;  %v770_v17 = vsub.f32 %v2933_v30, %v748_v1 }
 0x2b4   :  { %v3037_v33 = vpop.eup %2364  ;;  %v795_v46 = vmul.f32 1.442695, %v770_v17 }
 0x2b5   :  { %819 = vadd.xlane.f32.xlu0 %v3037_v33  ;;  %v750_v10 = vpop.xlane.xlu1 %749  ;;  %v3041_v9 = vpop.eup %2366 }
 0x2b6   :  { %2372 = vpow2.f32 %v795_v46  ;;  %v771_v53 = vsub.f32 %v2941_v41, %v750_v10 }
 0x2b8   :  { %v3043_v26 = vpop.eup %2368  ;;  %v797_v14 = vmul.f32 1.442695, %v771_v53 }
 0x2b9   :  { %823 = vadd.xlane.f32.xlu0 %v3041_v9  ;;  %821 = vadd.xlane.f32.xlu1 %v3043_v26  ;;  %v752_v30 = vpop.xlane.xlu1 %751 }
 0x2ba   :  { %2374 = vpow2.f32 %v797_v14  ;;  %v772_v28 = vsub.f32 %v2950_v57, %v752_v30 }
 0x2bc   :  { %v3048_v11 = vpop.eup %2370  ;;  %v799_v19 = vmul.f32 1.442695, %v772_v28 }
 0x2bd   :  { %825 = vadd.xlane.f32.xlu1 %v3048_v11  ;;  %v754_v41 = vpop.xlane.xlu1 %753 }
 0x2be   :  { %2376 = vpow2.f32 %v799_v19  ;;  %v773_v40 = vsub.f32 %v2958_v31, %v754_v41  ;;  %v1060_v41 = vld [vmem:[#allocation8 + $0x18] sm:$0xff] }
 0x2c0   :  { %v3054_v58 = vpop.eup %2372  ;;  %v801_v45 = vmul.f32 1.442695, %v773_v40  ;;  %v1058_v40 = vld [vmem:[#allocation8 + $0x8] sm:$0xff] }
 0x2c1   :  { %827 = vadd.xlane.f32.xlu0 %v3054_v58  ;;  %v756_v1 = vpop.xlane.xlu1 %755 }
 0x2c2   :  { %2378 = vpow2.f32 %v801_v45  ;;  %v774_v57 = vsub.f32 %v2965_v4, %v756_v1  ;;  %v1062_v1 = vld [vmem:[#allocation8 + $0x28] sm:$0xff] }
 0x2c4   :  { %v3058_v17 = vpop.eup %2374  ;;  %v803_v27 = vmul.f32 1.442695, %v774_v57  ;;  %v2244_v57 = vpack.c.bf16 %v1062_v1, %v1058_v40  ;;  %v1086_v1 = vld [vmem:[#allocation8 + $0xe8] sm:$0xff] }
 0x2c5   :  { %829 = vadd.xlane.f32.xlu1 %v3058_v17  ;;  %v758_v46 = vpop.xlane.xlu1 %757 }
 0x2c6   :  { %2380 = vpow2.f32 %v803_v27  ;;  %v775_v31 = vsub.f32 %v2972_v23, %v758_v46  ;;  %v1057_v27 = vld [vmem:[#allocation8] sm:$0xff]  ;;  %2245 = vmatprep.subr.bf16.mxu1 %v2244_v57  ;;  %v1090_v57 = vld [vmem:[#allocation8 + $0x108] sm:$0xff] }
 0x2c7   :  { %v1061_v46 = vld [vmem:[#allocation8 + $0x20] sm:$0xff] }
 0x2c8   :  { %v3062_v47 = vpop.eup %2376  ;;  %v805_v10 = vmul.f32 1.442695, %v775_v31  ;;  %v2246_v31 = vpack.c.bf16 %v1061_v46, %v1057_v27  ;;  %v1081_v27 = vld [vmem:[#allocation8 + $0xc0] sm:$0xff] }
 0x2c9   :  { %831 = vadd.xlane.f32.xlu0 %v3062_v47  ;;  %v760_v53 = vpop.xlane.xlu1 %759  ;;  %v1085_v46 = vld [vmem:[#allocation8 + $0xe0] sm:$0xff] }
 0x2ca   :  { %2382 = vpow2.f32 %v805_v10  ;;  %v776_v14 = vsub.f32 %v2979_v16, %v760_v53  ;;  %v1064_v16 = vld [vmem:[#allocation8 + $0x38] sm:$0xff]  ;;  %v1066_v10 = vld [vmem:[#allocation8 + $0x48] sm:$0xff]  ;;  %2247 = vmatpush1.bf16.msra.mxu1 %v2246_v31  ;;  %v2258_v31 = vpack.c.bf16 %v1085_v46, %v1081_v27 }
 0x2cb   :  { %v2276_v45 = vpack.c.bf16 %v1064_v16, %v1060_v41  ;;  %v1070_v53 = vld [vmem:[#allocation8 + $0x68] sm:$0xff]  ;;  %v1077_v41 = vld [vmem:[#allocation8 + $0xa0] sm:$0xff] }
 0x2cc   :  { %v3066_v30 = vpop.eup %2378  ;;  %v807_v4 = vmul.f32 1.442695, %v776_v14  ;;  %v2248_v14 = vpack.c.bf16 %v1070_v53, %v1066_v10  ;;  %v1082_v16 = vld [vmem:[#allocation8 + $0xc8] sm:$0xff]  ;;  %v2254_v40 = vpack.c.bf16 %v1077_v41, %v1073_v50  ;;  %v1097_v50 = vld [vmem:[#allocation8 + $0x140] sm:$0xff] }
 0x2cd   :  { %833 = vadd.xlane.f32.xlu1 %v3066_v30  ;;  %2277 = vmatprep.subr.bf16.mxu0 %v2276_v45  ;;  %v2256_v45 = vpack.c.bf16 %v1086_v1, %v1082_v16  ;;  %v1094_v10 = vld [vmem:[#allocation8 + $0x128] sm:$0xff]  ;;  %v1101_v41 = vld [vmem:[#allocation8 + $0x160] sm:$0xff] }
 0x2ce   :  { %2384 = vpow2.f32 %v807_v4  ;;  %v1065_v4 = vld [vmem:[#allocation8 + $0x40] sm:$0xff]  ;;  %2249 = vmatprep.subr.bf16.mxu1 %v2248_v14  ;;  %v2260_v53 = vpack.c.bf16 %v1094_v10, %v1090_v57  ;;  %v1059_v57 = vld [vmem:[#allocation8 + $0x10] sm:$0xff] }
 0x2cf   :  { %v2250_v0 = vpack.c.bf16 %v1069_v61, %v1065_v4  ;;  %v1089_v61 = vld [vmem:[#allocation8 + $0x100] sm:$0xff]  ;;  %v1098_v4 = vld [vmem:[#allocation8 + $0x148] sm:$0xff]  ;;  %v1063_v10 = vld [vmem:[#allocation8 + $0x30] sm:$0xff] }
 0x2d0   :  { %v3069_v28 = vpop.eup %2380  ;;  %v1093_v14 = vld [vmem:[#allocation8 + $0x120] sm:$0xff] }
 0x2d1   :  { %835 = vadd.xlane.f32.xlu0 %v3069_v28  ;;  %2251 = vmatpush1.bf16.msra.mxu1 %v2250_v0  ;;  %v2262_v12 = vpack.c.bf16 %v1093_v14, %v1089_v61  ;;  %v2264_v0 = vpack.c.bf16 %v1102_v7, %v1098_v4  ;;  %v2278_v4 = vpack.c.bf16 %v1063_v10, %v1059_v57  ;;  %v1084_v57 = vld [vmem:[#allocation8 + $0xd8] sm:$0xff] }
 0x2d2   :  { %2253 = vmatprep.subr.bf16.mxu1 %v2252_v60  ;;  %v2266_v60 = vpack.c.bf16 %v1101_v41, %v1097_v50  ;;  %v1071_v50 = vld [vmem:[#allocation8 + $0x70] sm:$0xff]  ;;  %v1076_v41 = vld [vmem:[#allocation8 + $0x98] sm:$0xff] }
 0x2d4   :  { %v3072_v23 = vpop.eup %2382 }
 0x2d5   :  { %837 = vadd.xlane.f32.xlu1 %v3072_v23  ;;  %2255 = vmatpush1.bf16.msra.mxu1 %v2254_v40 }
 0x2d6   :  { %2257 = vmatprep.subr.bf16.mxu1 %v2256_v45 }
 0x2d8   :  { %v3075_v19 = vpop.eup %2384 }
 0x2d9   :  { %839 = vadd.xlane.f32.xlu0 %v3075_v19  ;;  %2259 = vmatpush1.bf16.msra.mxu1 %v2258_v31  ;;  %v1068_v31 = vld [vmem:[#allocation8 + $0x58] sm:$0xff] }
 0x2da   :  { %2261 = vmatprep.subr.bf16.mxu1 %v2260_v53  ;;  %v1072_v53 = vld [vmem:[#allocation8 + $0x78] sm:$0xff] }
 0x2dd   :  { %2263 = vmatpush1.bf16.msra.mxu1 %v2262_v12  ;;  %v2280_v12 = vpack.c.bf16 %v1072_v53, %v1068_v31 }
 0x2de   :  { %2265 = vmatprep.subr.bf16.mxu1 %v2264_v0  ;;  %v1067_v0 = vld [vmem:[#allocation8 + $0x50] sm:$0xff] }
 0x2e1   :  { %2267 = vmatpush1.bf16.msra.mxu1 %v2266_v60  ;;  %v1080_v60 = vld [vmem:[#allocation8 + $0xb8] sm:$0xff] }
 0x32e   :  { %v810_v16 = vpop.xlane.xlu1 %809 }
 0x32f   :  { %2386 = vrcp.f32 %v810_v16 }
 0x332   :  { %v812_v40 = vpop.xlane.xlu1 %811 }
 0x333   :  { %2388 = vrcp.f32 %v812_v40 }
 0x336   :  { %v814_v1 = vpop.xlane.xlu1 %813 }
 0x337   :  { %2390 = vrcp.f32 %v814_v1 }
 0x339   :  { %v2387_v45 = vpop.eup %2386 }
 0x33a   :  { %v816_v27 = vpop.xlane.xlu0 %815  ;;  %v857_v46 = vmul.f32 %v2387_v45, %v3008_v49  ;;  %v2282_v49 = vpack.c.bf16 %v1071_v50, %v1067_v0  ;;  %v2284_v45 = vpack.c.bf16 %v1080_v60, %v1076_v41  ;;  %v1087_v0 = vld [vmem:[#allocation8 + $0xf0] sm:$0xff] }
 0x33b   :  { %2392 = vrcp.f32 %v816_v27  ;;  %v1075_v27 = vld [vmem:[#allocation8 + $0x90] sm:$0xff] }
 0x33c   :  { %2068 = vmatprep.mubr.f32.mxu0 %v857_v46  ;;  %v1079_v46 = vld [vmem:[#allocation8 + $0xb0] sm:$0xff] }
 0x33d   :  { %v2389_v61 = vpop.eup %2388 }
 0x33e   :  { %v818_v14 = vpop.xlane.xlu1 %817  ;;  %v858_v7 = vmul.f32 %v2389_v61, %v3012_v62  ;;  %v1088_v62 = vld [vmem:[#allocation8 + $0xf8] sm:$0xff] }
 0x33f   :  { %2394 = vrcp.f32 %v818_v14  ;;  %v2286_v14 = vpack.c.bf16 %v1079_v46, %v1075_v27 }
 0x340   :  { %2069 = vmatmul.mubr.f32.vlgmr.msra.gmra.mrb[32].mxu0 %v858_v7  ;;  %v1083_v7 = vld [vmem:[#allocation8 + $0xd0] sm:$0xff] }
 0x341   :  { %v2391_v16 = vpop.eup %2390  ;;  %2279 = vmatpush1.bf16.msra.mxu0 %v2278_v4  ;;  %v2288_v4 = vpack.c.bf16 %v1088_v62, %v1084_v57 }
 0x342   :  { %v820_v40 = vpop.xlane.xlu0 %819  ;;  %v859_v1 = vmul.f32 %v2391_v16, %v3019_v8  ;;  %2281 = vmatprep.subr.bf16.mxu0 %v2280_v12  ;;  %v1092_v8 = vld [vmem:[#allocation8 + $0x118] sm:$0xff]  ;;  %v2290_v16 = vpack.c.bf16 %v1087_v0, %v1083_v7 }
 0x343   :  { %2396 = vrcp.f32 %v820_v40  ;;  %v1096_v12 = vld [vmem:[#allocation8 + $0x138] sm:$0xff]  ;;  %v1091_v40 = vld [vmem:[#allocation8 + $0x110] sm:$0xff] }
 0x344   :  { %2071 = vmatprep.mubr.f32.mxu0 %v859_v1  ;;  %v1100_v1 = vld [vmem:[#allocation8 + $0x158] sm:$0xff] }
 0x345   :  { %v2393_v10 = vpop.eup %2392  ;;  %2283 = vmatpush1.bf16.msra.mxu0 %v2282_v49  ;;  %v1095_v49 = vld [vmem:[#allocation8 + $0x130] sm:$0xff] }
 0x346   :  { %v824_v31 = vpop.xlane.xlu0 %823  ;;  %v822_v53 = vpop.xlane.xlu1 %821  ;;  %v860_v61 = vmul.f32 %v2393_v10, %v3025_v48  ;;  %2285 = vmatprep.subr.bf16.mxu0 %v2284_v45  ;;  %v2292_v48 = vpack.c.bf16 %v1096_v12, %v1092_v8  ;;  %v1104_v45 = vld [vmem:[#allocation8 + $0x178] sm:$0xff]  ;;  %v2294_v62 = vpack.c.bf16 %v1095_v49, %v1091_v40 }
 0x347   :  { %2398 = vrcp.f32 %v824_v31  ;;  %v2296_v10 = vpack.c.bf16 %v1104_v45, %v1100_v1  ;;  %v1103_v31 = vld [vmem:[#allocation8 + $0x170] sm:$0xff] }
 0x348   :  { %2400 = vrcp.f32 %v822_v53  ;;  %2072 = vmatmul.mubr.f32.gmra.mrb[34].mxu0 %v860_v61  ;;  %v1108_v61 = vld [vmem:[#allocation8 + $0x198] sm:$0xff] }
 0x349   :  { %v2395_v50 = vpop.eup %2394  ;;  %2287 = vmatpush1.bf16.msra.mxu0 %v2286_v14  ;;  %v1112_v14 = vld [vmem:[#allocation8 + $0x1b8] sm:$0xff] }
 0x34a   :  { %v826_v41 = vpop.xlane.xlu1 %825  ;;  %v861_v60 = vmul.f32 %v2395_v50, %v3031_v36  ;;  %2289 = vmatprep.subr.bf16.mxu0 %v2288_v4  ;;  %v1099_v36 = vld [vmem:[#allocation8 + $0x150] sm:$0xff]  ;;  %v2300_v12 = vpack.c.bf16 %v1112_v14, %v1108_v61  ;;  %v1110_v61 = vld [vmem:[#allocation8 + $0x1a8] sm:$0xff] }
 0x34b   :  { %2402 = vrcp.f32 %v826_v41  ;;  %v1107_v14 = vld [vmem:[#allocation8 + $0x190] sm:$0xff] }
 0x34c   :  { %2074 = vmatprep.mubr.f32.mxu0 %v861_v60 }
 0x34d   :  { %v2397_v27 = vpop.eup %2396  ;;  %2291 = vmatpush1.bf16.msra.mxu0 %v2290_v16 }
 0x34e   :  { %v828_v46 = vpop.xlane.xlu0 %827  ;;  %v862_v57 = vmul.f32 %v2397_v27, %v3037_v33  ;;  %2293 = vmatprep.subr.bf16.mxu0 %v2292_v48  ;;  %v2298_v33 = vpack.c.bf16 %v1103_v31, %v1099_v36 }
 0x34f   :  { %2404 = vrcp.f32 %v828_v46 }
 0x350   :  { %2075 = vmatmul.mubr.f32.gmra.mrb[36].mxu0 %v862_v57 }
 0x351   :  { %v2399_v53 = vpop.eup %2398  ;;  %2295 = vmatpush1.bf16.msra.mxu0 %v2294_v62 }
 0x352   :  { %v2401_v4 = vpop.eup %2400  ;;  %v830_v7 = vpop.xlane.xlu1 %829  ;;  %v864_v0 = vmul.f32 %v2399_v53, %v3041_v9  ;;  %2297 = vmatprep.subr.bf16.mxu0 %v2296_v10  ;;  %v1106_v53 = vld [vmem:[#allocation8 + $0x188] sm:$0xff] }
 0x353   :  { %2406 = vrcp.f32 %v830_v7  ;;  %v863_v8 = vmul.f32 %v2401_v4, %v3043_v26  ;;  %v1111_v4 = vld [vmem:[#allocation8 + $0x1b0] sm:$0xff]  ;;  %v1105_v7 = vld [vmem:[#allocation8 + $0x180] sm:$0xff] }
 0x355   :  { %v2403_v50 = vpop.eup %2402  ;;  %2077 = vmatprep.mubr.f32.mxu0 %v863_v8  ;;  %2299 = vmatpush1.bf16.msra.mxu0 %v2298_v33  ;;  %v2302_v8 = vpack.c.bf16 %v1111_v4, %v1107_v14  ;;  %v1116_v33 = vld [vmem:[#allocation8 + $0x1d8] sm:$0xff] }
 0x356   :  { %2078 = vmatmul.mubr.f32.gmra.mrb[38].mxu0 %v864_v0  ;;  %v832_v41 = vpop.xlane.xlu0 %831  ;;  %v865_v60 = vmul.f32 %v2403_v50, %v3048_v11  ;;  %2301 = vmatprep.subr.bf16.mxu0 %v2300_v12  ;;  %v1109_v0 = vld [vmem:[#allocation8 + $0x1a0] sm:$0xff]  ;;  %v1120_v12 = vld [vmem:[#allocation8 + $0x1f8] sm:$0xff]  ;;  %v1114_v50 = vld [vmem:[#allocation8 + $0x1c8] sm:$0xff] }
 0x357   :  { %2408 = vrcp.f32 %v832_v41  ;;  %v1118_v41 = vld [vmem:[#allocation8 + $0x1e8] sm:$0xff] }
 0x358   :  { %2080 = vmatprep.mubr.f32.mxu0 %v865_v60  ;;  %v1115_v60 = vld [vmem:[#allocation8 + $0x1d0] sm:$0xff] }
 0x359   :  { %v2405_v16 = vpop.eup %2404  ;;  %2303 = vmatpush1.bf16.msra.mxu0 %v2302_v8 }
 0x35a   :  { %v834_v48 = vpop.xlane.xlu1 %833  ;;  %v866_v9 = vmul.f32 %v2405_v16, %v3054_v58  ;;  %v2272_v16 = vpack.c.bf16 %v1118_v41, %v1114_v50 }
 0x35b   :  { %2410 = vrcp.f32 %v834_v48 }
 0x35c   :  { %2081 = vmatmul.mubr.f32.gmra.mrb[40].mxu0 %v866_v9  ;;  %v1113_v9 = vld [vmem:[#allocation8 + $0x1c0] sm:$0xff] }
 0x35d   :  { %v2407_v26 = vpop.eup %2406 }
 0x35e   :  { %v836_v40 = vpop.xlane.xlu0 %835  ;;  %v867_v49 = vmul.f32 %v2407_v26, %v3058_v17  ;;  %v1117_v26 = vld [vmem:[#allocation8 + $0x1e0] sm:$0xff] }
 0x35f   :  { %2412 = vrcp.f32 %v836_v40  ;;  %v2274_v40 = vpack.c.bf16 %v1117_v26, %v1113_v9 }
 0x360   :  { %2083 = vmatprep.mubr.f32.mxu0 %v867_v49 }
 0x361   :  { %v2409_v1 = vpop.eup %2408 }
 0x362   :  { %v838_v45 = vpop.xlane.xlu1 %837  ;;  %v868_v11 = vmul.f32 %v2409_v1, %v3062_v47  ;;  %v3455_v47 = vmov 0.0  }
 0x363   :  { %2414 = vrcp.f32 %v838_v45  ;;  %v3099_v45 = vld [vmem:[%s3440_s3] ss:$0 sm:$0xff] }
 0x364   :  { %2084 = vmatmul.mubr.f32.gmra.mrb[42].mxu0 %v868_v11 }
 0x365   :  { %v2411_v27 = vpop.eup %2410 }
 0x366   :  { %v840_v46 = vpop.xlane.xlu0 %839  ;;  %v869_v57 = vmul.f32 %v2411_v27, %v3066_v30  ;;  %v2268_v30 = vpack.c.bf16 %v1110_v61, %v1106_v53 }
 0x367   :  { %2416 = vrcp.f32 %v840_v46 }
 0x368   :  { %2086 = vmatprep.mubr.f32.mxu0 %v869_v57  ;;  %2269 = vmatprep.subr.bf16.mxu1 %v2268_v30 }
 0x369   :  { %v2413_v58 = vpop.eup %2412 }
 0x36a   :  { %v870_v62 = vmul.f32 %v2413_v58, %v3069_v28  ;;  %v2270_v28 = vpack.c.bf16 %v1109_v0, %v1105_v7 }
 0x36c   :  { %2087 = vmatmul.mubr.f32.gmra.mrb[44].mxu0 %v870_v62  ;;  %2271 = vmatpush1.bf16.msra.mxu1 %v2270_v28 }
 0x36d   :  { %v2415_v10 = vpop.eup %2414  ;;  %2273 = vmatprep.subr.bf16.mxu1 %v2272_v16 }
 0x36e   :  { %v871_v17 = vmul.f32 %v2415_v10, %v3072_v23  ;;  %v2304_v23 = vpack.c.bf16 %v1120_v12, %v1116_v33 }
 0x370   :  { %2089 = vmatprep.mubr.f32.mxu0 %v871_v17  ;;  %2305 = vmatprep.subr.bf16.mxu0 %v2304_v23 }
 0x371   :  { %v2417_v36 = vpop.eup %2416  ;;  %2275 = vmatpush1.bf16.msra.mxu1 %v2274_v40 }
 0x372   :  { %v872_v31 = vmul.f32 %v2417_v36, %v3075_v19  ;;  %v1119_v19 = vld [vmem:[#allocation8 + $0x1f0] sm:$0xff] }
 0x373   :  { %v2306_v48 = vpack.c.bf16 %v1119_v19, %v1115_v60 }
 0x374   :  { %2090 = vmatmul.mubr.f32.gmra.mrb[46].mxu0 %v872_v31 }
 0x375   :  { %1346 = vmatprep.mubr.f32.mxu0 %v3455_v47  ;;  %2307 = vmatpush1.bf16.msra.mxu0 %v2306_v48 }
 0x413   :  { %v2070_v49 = vpop.f32.mrb[32].mxu0 }
 0x414   :  { %v945_v1 = vadd.f32 %v2070_v49, %v2984_v32  ;;  %v939_v11 = vpop.f32.mrb[33].mxu0 }
 0x415   :  { %v940_v27 = vadd.f32 %v939_v11, %v2982_v22 }
 0x416   :  { %v1026_v57 = vadd.f32 %v3099_v45, %v945_v1 }
 0x417   :  { %v1025_v46 = vadd.f32 %v3099_v45, %v940_v27 }
 0x418   :  { %v1042_v36 = vmax.f32 %v1026_v57, 0.0 }
 0x419   :  { %v1041_v58 = vmax.f32 %v1025_v46, 0.0 }
 0x41b   :  { %v2073_v62 = vpop.f32.mrb[34].mxu0  ;;  %1186 = vmatmul.mubr.f32.vlgmr.msra.gmra.mrb[32].mxu1 %v1041_v58  ;;  %1347 = vmatmul.mubr.f32.vlgmr.msra.gmra.mrb[48].mxu0 %v1041_v58 }
 0x41c   :  { %v955_v10 = vadd.f32 %v2073_v62, %v2988_v39  ;;  %v949_v17 = vpop.f32.mrb[35].mxu0  ;;  %1191 = vmatprep.mubr.f32.mxu1 %v3455_v47  ;;  %1352 = vmatprep.mubr.f32.mxu0 %v3455_v47 }
 0x41d   :  { %v950_v32 = vadd.f32 %v949_v17, %v2986_v35 }
 0x41e   :  { %v1028_v39 = vadd.f32 %v3099_v45, %v955_v10 }
 0x41f   :  { %v1027_v22 = vadd.f32 %v3099_v45, %v950_v32  ;;  %1192 = vmatmul.mubr.f32.gmra.mrb[34].mxu1 %v1042_v36  ;;  %1353 = vmatmul.mubr.f32.gmra.mrb[50].mxu0 %v1042_v36 }
 0x420   :  { %1197 = vmatprep.mubr.f32.mxu1 %v3455_v47  ;;  %1358 = vmatprep.mubr.f32.mxu0 %v3455_v47  ;;  %v1044_v30 = vmax.f32 %v1028_v39, 0.0 }
 0x421   :  { %v1043_v31 = vmax.f32 %v1027_v22, 0.0 }
 0x423   :  { %v2076_v53 = vpop.f32.mrb[36].mxu0  ;;  %1198 = vmatmul.mubr.f32.gmra.mrb[36].mxu1 %v1043_v31  ;;  %1359 = vmatmul.mubr.f32.gmra.mrb[52].mxu0 %v1043_v31 }
 0x424   :  { %v965_v61 = vadd.f32 %v2076_v53, %v2992_v51  ;;  %v959_v35 = vpop.f32.mrb[37].mxu0  ;;  %1203 = vmatprep.mubr.f32.mxu1 %v3455_v47  ;;  %1364 = vmatprep.mubr.f32.mxu0 %v3455_v47 }
 0x425   :  { %v960_v14 = vadd.f32 %v959_v35, %v2990_v42 }
 0x426   :  { %v1030_v51 = vadd.f32 %v3099_v45, %v965_v61 }
 0x427   :  { %v1029_v4 = vadd.f32 %v3099_v45, %v960_v14  ;;  %1204 = vmatmul.mubr.f32.gmra.mrb[38].mxu1 %v1044_v30  ;;  %1365 = vmatmul.mubr.f32.gmra.mrb[54].mxu0 %v1044_v30 }
 0x428   :  { %1209 = vmatprep.mubr.f32.mxu1 %v3455_v47  ;;  %1370 = vmatprep.mubr.f32.mxu0 %v3455_v47  ;;  %v1046_v33 = vmax.f32 %v1030_v51, 0.0 }
 0x429   :  { %v1045_v7 = vmax.f32 %v1029_v4, 0.0  ;;  %v2079_v0 = vpop.f32.mrb[38].mxu0 }
 0x42a   :  { %v975_v8 = vadd.f32 %v2079_v0, %v2997_v25  ;;  %v969_v42 = vpop.f32.mrb[39].mxu0 }
 0x42b   :  { %v970_v28 = vadd.f32 %v969_v42, %v2994_v55  ;;  %1210 = vmatmul.mubr.f32.gmra.mrb[40].mxu1 %v1045_v7  ;;  %1371 = vmatmul.mubr.f32.gmra.mrb[56].mxu0 %v1045_v7 }
 0x42c   :  { %1215 = vmatprep.mubr.f32.mxu1 %v3455_v47  ;;  %1376 = vmatprep.mubr.f32.mxu0 %v3455_v47  ;;  %v1032_v55 = vadd.f32 %v3099_v45, %v975_v8 }
 0x42d   :  { %v1031_v12 = vadd.f32 %v3099_v45, %v970_v28 }
 0x42e   :  { %v1048_v19 = vmax.f32 %v1032_v55, 0.0 }
 0x42f   :  { %v2082_v50 = vpop.f32.mrb[40].mxu0  ;;  %1216 = vmatmul.mubr.f32.gmra.mrb[42].mxu1 %v1046_v33  ;;  %1377 = vmatmul.mubr.f32.gmra.mrb[58].mxu0 %v1046_v33  ;;  %v1047_v60 = vmax.f32 %v1031_v12, 0.0 }
 0x430   :  { %v985_v23 = vadd.f32 %v2082_v50, %v3003_v13  ;;  %v979_v41 = vpop.f32.mrb[41].mxu0  ;;  %1221 = vmatprep.mubr.f32.mxu1 %v3455_v47  ;;  %1382 = vmatprep.mubr.f32.mxu0 %v3455_v47 }
 0x431   :  { %v980_v25 = vadd.f32 %v979_v41, %v3000_v6 }
 0x432   :  { %v1034_v26 = vadd.f32 %v3099_v45, %v985_v23 }
 0x433   :  { %1222 = vmatmul.mubr.f32.gmra.mrb[44].mxu1 %v1047_v60  ;;  %1383 = vmatmul.mubr.f32.gmra.mrb[60].mxu0 %v1047_v60  ;;  %v1033_v13 = vadd.f32 %v3099_v45, %v980_v25 }
 0x434   :  { %1227 = vmatprep.mubr.f32.mxu1 %v3455_v47  ;;  %1388 = vmatprep.mubr.f32.mxu0 %v3455_v47  ;;  %v1050_v49 = vmax.f32 %v1034_v26, 0.0 }
 0x435   :  { %v1049_v40 = vmax.f32 %v1033_v13, 0.0 }
 0x437   :  { %v2085_v16 = vpop.f32.mrb[42].mxu0  ;;  %1228 = vmatmul.mubr.f32.gmra.mrb[46].mxu1 %v1048_v19  ;;  %1389 = vmatmul.mubr.f32.gmra.mrb[62].mxu0 %v1048_v19 }
 0x438   :  { %v995_v48 = vadd.f32 %v2085_v16, %v3014_v21  ;;  %v989_v6 = vpop.f32.mrb[43].mxu0  ;;  %1233 = vmatprep.mubr.f32.mxu1 %v3455_v47  ;;  %1394 = vmatprep.mubr.f32.mxu0 %v3455_v47 }
 0x439   :  { %v990_v9 = vadd.f32 %v989_v6, %v3006_v43 }
 0x43a   :  { %v1036_v46 = vadd.f32 %v3099_v45, %v995_v48 }
 0x43b   :  { %1234 = vmatmul.mubr.f32.gmra.mrb[48].mxu1 %v1049_v40  ;;  %1395 = vmatmul.mubr.f32.gmra.mrb[64].mxu0 %v1049_v40  ;;  %v1035_v21 = vadd.f32 %v3099_v45, %v990_v9 }
 0x43c   :  { %1239 = vmatprep.mubr.f32.mxu1 %v3455_v47  ;;  %1400 = vmatprep.mubr.f32.mxu0 %v3455_v47  ;;  %v1052_v58 = vmax.f32 %v1036_v46, 0.0 }
 0x43d   :  { %v1051_v57 = vmax.f32 %v1035_v21, 0.0 }
 0x43f   :  { %v2088_v1 = vpop.f32.mrb[44].mxu0  ;;  %1240 = vmatmul.mubr.f32.gmra.mrb[50].mxu1 %v1050_v49  ;;  %1401 = vmatmul.mubr.f32.gmra.mrb[66].mxu0 %v1050_v49 }
 0x440   :  { %v1005_v11 = vadd.f32 %v2088_v1, %v3027_v38  ;;  %v999_v43 = vpop.f32.mrb[45].mxu0  ;;  %1245 = vmatprep.mubr.f32.mxu1 %v3455_v47  ;;  %1406 = vmatprep.mubr.f32.mxu0 %v3455_v47 }
 0x441   :  { %v1000_v27 = vadd.f32 %v999_v43, %v3021_v18 }
 0x442   :  { %v1038_v32 = vadd.f32 %v3099_v45, %v1005_v11 }
 0x443   :  { %1246 = vmatmul.mubr.f32.gmra.mrb[52].mxu1 %v1051_v57  ;;  %1407 = vmatmul.mubr.f32.gmra.mrb[68].mxu0 %v1051_v57  ;;  %v1037_v38 = vadd.f32 %v3099_v45, %v1000_v27 }
 0x444   :  { %1251 = vmatprep.mubr.f32.mxu1 %v3455_v47  ;;  %1412 = vmatprep.mubr.f32.mxu0 %v3455_v47  ;;  %v1054_v22 = vmax.f32 %v1038_v32, 0.0 }
 0x445   :  { %v1053_v36 = vmax.f32 %v1037_v38, 0.0 }
 0x447   :  { %v2091_v62 = vpop.f32.mrb[46].mxu0  ;;  %1252 = vmatmul.mubr.f32.gmra.mrb[54].mxu1 %v1052_v58  ;;  %1413 = vmatmul.mubr.f32.gmra.mrb[70].mxu0 %v1052_v58 }
 0x448   :  { %v1015_v10 = vadd.f32 %v2091_v62, %v3052_v54  ;;  %v1009_v18 = vpop.f32.mrb[47].mxu0  ;;  %1257 = vmatprep.mubr.f32.mxu1 %v3455_v47  ;;  %1418 = vmatprep.mubr.f32.mxu0 %v3455_v47 }
 0x449   :  { %v1010_v17 = vadd.f32 %v1009_v18, %v3033_v59 }
 0x44a   :  { %v1040_v59 = vadd.f32 %v3099_v45, %v1015_v10 }
 0x44b   :  { %1258 = vmatmul.mubr.f32.gmra.mrb[56].mxu1 %v1053_v36  ;;  %1419 = vmatmul.mubr.f32.gmra.mrb[72].mxu0 %v1053_v36  ;;  %v1039_v54 = vadd.f32 %v3099_v45, %v1010_v17 }
 0x44c   :  { %1263 = vmatprep.mubr.f32.mxu1 %v3455_v47  ;;  %1424 = vmatprep.mubr.f32.mxu0 %v3455_v47  ;;  %v1056_v39 = vmax.f32 %v1040_v59, 0.0 }
 0x44d   :  { %v1055_v31 = vmax.f32 %v1039_v54, 0.0 }
 0x44f   :  { %1264 = vmatmul.mubr.f32.gmra.mrb[58].mxu1 %v1054_v22  ;;  %1425 = vmatmul.mubr.f32.gmra.mrb[74].mxu0 %v1054_v22 }
 0x450   :  { %1269 = vmatprep.mubr.f32.mxu1 %v3455_v47  ;;  %1430 = vmatprep.mubr.f32.mxu0 %v3455_v47 }
 0x453   :  { %1270 = vmatmul.mubr.f32.gmra.mrb[60].mxu1 %v1055_v31  ;;  %1431 = vmatmul.mubr.f32.gmra.mrb[76].mxu0 %v1055_v31 }
 0x454   :  { %1275 = vmatprep.mubr.f32.mxu1 %v3455_v47  ;;  %1436 = vmatprep.mubr.f32.mxu0 %v3455_v47 }
 0x457   :  { %1276 = vmatmul.mubr.f32.gmra.mrb[62].mxu1 %v1056_v39  ;;  %1437 = vmatmul.mubr.f32.gmra.mrb[78].mxu0 %v1056_v39 }
 0x4ee   :  { %v1187_v53 = vpop.f32.mrb[32].mxu1  ;;  %v3162_v61 = vpop.f32.mrb[48].mxu0 }
 0x4ef   :  { %v3164_v35 = vpop.f32.mrb[33].mxu1  ;;  %v1350_v14 = vpop.f32.mrb[49].mxu0 }
 0x4f0   :  { %1477 = vperm.xlu1 %2353, %v1350_v14  }
 0x4f2   :  { %v1193_v30 = vpop.f32.mrb[34].mxu1  ;;  %v3166_v4 = vpop.f32.mrb[50].mxu0 }
 0x4f3   :  { %v2308_v45 = vpack.c.bf16 %v1193_v30, %v1187_v53  ;;  %v3168_v7 = vpop.f32.mrb[35].mxu1  ;;  %v1356_v0 = vpop.f32.mrb[51].mxu0 }
 0x4f4   :  { %1482 = vperm.xlu0 %2352, %v1356_v0  }
 0x4f5   :  { %2309 = vmatprep.subr.bf16.mxu1 %v2308_v45 }
 0x4f6   :  { %v1199_v47 = vpop.f32.mrb[36].mxu1  ;;  %v3170_v51 = vpop.f32.mrb[52].mxu0  ;;  %2311 = vmatpush3.bf16.msra.mxu1 %v2308_v45 }
 0x4f7   :  { %v3172_v8 = vpop.f32.mrb[37].mxu1  ;;  %v1362_v42 = vpop.f32.mrb[53].mxu0 }
 0x4f8   :  { %1487 = vperm.xlu1 %2353, %v1362_v42  }
 0x4fa   :  { %v1205_v28 = vpop.f32.mrb[38].mxu1  ;;  %v3174_v33 = vpop.f32.mrb[54].mxu0 }
 0x4fb   :  { %v2312_v12 = vpack.c.bf16 %v1205_v28, %v1199_v47  ;;  %v3176_v50 = vpop.f32.mrb[39].mxu1  ;;  %v1368_v23 = vpop.f32.mrb[55].mxu0 }
 0x4fc   :  { %1492 = vperm.xlu1 %2353, %v1368_v23  }
 0x4fd   :  { %2313 = vmatprep.subr.bf16.mxu1 %v2312_v12 }
 0x4fe   :  { %v1211_v41 = vpop.f32.mrb[40].mxu1  ;;  %v3178_v25 = vpop.f32.mrb[56].mxu0  ;;  %2315 = vmatpush3.bf16.msra.mxu1 %v2312_v12 }
 0x4ff   :  { %v3180_v55 = vpop.f32.mrb[41].mxu1  ;;  %v1374_v60 = vpop.f32.mrb[57].mxu0 }
 0x500   :  { %1497 = vperm.xlu0 %2352, %v1374_v60  }
 0x502   :  { %v1217_v19 = vpop.f32.mrb[42].mxu1  ;;  %v3182_v13 = vpop.f32.mrb[58].mxu0 }
 0x503   :  { %v2316_v16 = vpack.c.bf16 %v1217_v19, %v1211_v41  ;;  %v3184_v48 = vpop.f32.mrb[43].mxu1  ;;  %v1380_v6 = vpop.f32.mrb[59].mxu0 }
 0x504   :  { %1502 = vperm.xlu1 %2353, %v1380_v6  }
 0x505   :  { %2317 = vmatprep.subr.bf16.mxu1 %v2316_v16 }
 0x506   :  { %v1223_v9 = vpop.f32.mrb[44].mxu1  ;;  %v3186_v26 = vpop.f32.mrb[60].mxu0  ;;  %2319 = vmatpush3.bf16.msra.mxu1 %v2316_v16 }
 0x507   :  { %v3188_v40 = vpop.f32.mrb[45].mxu1  ;;  %v1386_v49 = vpop.f32.mrb[61].mxu0 }
 0x508   :  { %1507 = vperm.xlu0 %2352, %v1386_v49  }
 0x50a   :  { %v1229_v21 = vpop.f32.mrb[46].mxu1  ;;  %v3190_v1 = vpop.f32.mrb[62].mxu0 }
 0x50b   :  { %v2320_v11 = vpack.c.bf16 %v1229_v21, %v1223_v9  ;;  %v3192_v43 = vpop.f32.mrb[47].mxu1  ;;  %v1392_v27 = vpop.f32.mrb[63].mxu0 }
 0x50c   :  { %1512 = vperm.xlu1 %2353, %v1392_v27  }
 0x50d   :  { %2321 = vmatprep.subr.bf16.mxu1 %v2320_v11 }
 0x50e   :  { %v1235_v46 = vpop.f32.mrb[48].mxu1  ;;  %v1396_v57 = vpop.f32.mrb[64].mxu0  ;;  %2323 = vmatpush3.bf16.msra.mxu1 %v2320_v11 }
 0x50f   :  { %v3194_v58 = vpop.f32.mrb[49].mxu1  ;;  %v1398_v38 = vpop.f32.mrb[65].mxu0 }
 0x510   :  { %1517 = vperm.xlu0 %2352, %v1398_v38  }
 0x512   :  { %v1241_v62 = vpop.f32.mrb[50].mxu1  ;;  %v1402_v10 = vpop.f32.mrb[66].mxu0 }
 0x513   :  { %v2324_v18 = vpack.c.bf16 %v1241_v62, %v1235_v46  ;;  %v3196_v17 = vpop.f32.mrb[51].mxu1  ;;  %v1404_v32 = vpop.f32.mrb[67].mxu0 }
 0x514   :  { %1522 = vperm.xlu1 %2353, %v1404_v32  }
 0x515   :  { %2325 = vmatprep.subr.bf16.mxu1 %v2324_v18 }
 0x516   :  { %v1247_v36 = vpop.f32.mrb[52].mxu1  ;;  %v1408_v22 = vpop.f32.mrb[68].mxu0  ;;  %2327 = vmatpush3.bf16.msra.mxu1 %v2324_v18 }
 0x517   :  { %v3198_v54 = vpop.f32.mrb[53].mxu1  ;;  %v1410_v59 = vpop.f32.mrb[69].mxu0 }
 0x518   :  { %1527 = vperm.xlu0 %2352, %v1410_v59  }
 0x51a   :  { %v1253_v31 = vpop.f32.mrb[54].mxu1  ;;  %v1414_v39 = vpop.f32.mrb[70].mxu0 }
 0x51b   :  { %v2328_v53 = vpack.c.bf16 %v1253_v31, %v1247_v36  ;;  %v3200_v14 = vpop.f32.mrb[55].mxu1  ;;  %v1416_v30 = vpop.f32.mrb[71].mxu0  ;;  %v3456_v36 = vsub.s32 0, %v2840_v56 }
 0x51c   :  { %1532 = vperm.xlu1 %2353, %v1416_v30  }
 0x51d   :  { %2329 = vmatprep.subr.bf16.mxu1 %v2328_v53 }
 0x51e   :  { %v1259_v45 = vpop.f32.mrb[56].mxu1  ;;  %v1420_v0 = vpop.f32.mrb[72].mxu0  ;;  %2331 = vmatpush3.bf16.msra.mxu1 %v2328_v53 }
 0x51f   :  { %v3202_v47 = vpop.f32.mrb[57].mxu1  ;;  %v1422_v42 = vpop.f32.mrb[73].mxu0 }
 0x520   :  { %1537 = vperm.xlu0 %2352, %v1422_v42  }
 0x522   :  { %v1265_v28 = vpop.f32.mrb[58].mxu1  ;;  %v1426_v12 = vpop.f32.mrb[74].mxu0 }
 0x523   :  { %v2332_v23 = vpack.c.bf16 %v1265_v28, %v1259_v45  ;;  %v3204_v41 = vpop.f32.mrb[59].mxu1  ;;  %v1428_v60 = vpop.f32.mrb[75].mxu0 }
 0x524   :  { %1542 = vperm.xlu1 %2353, %v1428_v60  }
 0x525   :  { %2333 = vmatprep.subr.bf16.mxu1 %v2332_v23 }
 0x526   :  { %v1271_v19 = vpop.f32.mrb[60].mxu1  ;;  %v1432_v16 = vpop.f32.mrb[76].mxu0  ;;  %2335 = vmatpush3.bf16.msra.mxu1 %v2332_v23 }
 0x527   :  { %v3206_v6 = vpop.f32.mrb[61].mxu1  ;;  %v1434_v9 = vpop.f32.mrb[77].mxu0 }
 0x528   :  { %1547 = vperm.xlu1 %2353, %v1434_v9  }
 0x52a   :  { %v1277_v49 = vpop.f32.mrb[62].mxu1  ;;  %v1438_v21 = vpop.f32.mrb[78].mxu0 }
 0x52b   :  { %v2336_v11 = vpack.c.bf16 %v1277_v49, %v1271_v19  ;;  %v3208_v27 = vpop.f32.mrb[63].mxu1  ;;  %v1440_v46 = vpop.f32.mrb[79].mxu0 }
 0x52c   :  { %1552 = vperm.xlu1 %2353, %v1440_v46  }
 0x52d   :  { %2337 = vmatprep.subr.bf16.mxu1 %v2336_v11 }
 0x52e   :  { %2339 = vmatpush3.bf16.msra.mxu1 %v2336_v11 }
 0x53e   :  { %1443 = vxpose.xlu0.b32.start [1/16] (narrow) %v3162_v61, 8 }
 0x542   :  { %1444 = vxpose.xlu0.b32.cont [2/16] (narrow) %v3166_v4, 8 }
 0x546   :  { %1445 = vxpose.xlu0.b32.cont [3/16] (narrow) %v3170_v51, 8 }
 0x54a   :  { %1446 = vxpose.xlu0.b32.cont [4/16] (narrow) %v3174_v33, 8 }
 0x54e   :  { %1447 = vxpose.xlu0.b32.cont [5/16] (narrow) %v3178_v25, 8 }
 0x552   :  { %1448 = vxpose.xlu0.b32.cont [6/16] (narrow) %v3182_v13, 8 }
 0x556   :  { %1449 = vxpose.xlu0.b32.cont [7/16] (narrow) %v3186_v26, 8 }
 0x55a   :  { %1450 = vxpose.xlu0.b32.cont [8/16] (narrow) %v3190_v1, 8 }
 0x55e   :  { %1451 = vxpose.xlu0.b32.cont [9/16] (narrow) %v1396_v57, 8 }
 0x562   :  { %1452 = vxpose.xlu0.b32.cont [10/16] (narrow) %v1402_v10, 8 }
 0x566   :  { %1453 = vxpose.xlu0.b32.cont [11/16] (narrow) %v1408_v22, 8 }
 0x56a   :  { %1454 = vxpose.xlu0.b32.cont [12/16] (narrow) %v1414_v39, 8 }
 0x56e   :  { %1455 = vxpose.xlu0.b32.cont [13/16] (narrow) %v1420_v0, 8 }
 0x56f   :  { %v1478_v61 = vpop.permute.xlu1 %1477 }
 0x572   :  { %1456 = vxpose.xlu0.b32.cont [14/16] (narrow) %v1426_v12, 8 }
 0x573   :  { %v1483_v4 = vpop.permute.xlu0 %1482 }
 0x576   :  { %1457 = vxpose.xlu0.b32.cont [15/16] (narrow) %v1432_v16, 8 }
 0x577   :  { %v1488_v51 = vpop.permute.xlu1 %1487 }
 0x57a   :  { %1458 = vxpose.xlu0.b32.end [16/16] (narrow) %v1438_v21, 8 }
 0x57b   :  { %v1493_v38 = vpop.permute.xlu1 %1492 }
 0x57f   :  { %v1498_v33 = vpop.permute.xlu0 %1497 }
 0x583   :  { %v1503_v62 = vpop.permute.xlu1 %1502 }
 0x587   :  { %v1508_v25 = vpop.permute.xlu0 %1507 }
 0x58b   :  { %v1513_v18 = vpop.permute.xlu1 %1512 }
 0x58f   :  { %v1518_v13 = vpop.permute.xlu0 %1517 }
 0x593   :  { %v1523_v32 = vpop.permute.xlu1 %1522 }
 0x597   :  { %v1528_v26 = vpop.permute.xlu0 %1527 }
 0x59b   :  { %v1533_v57 = vpop.permute.xlu1 %1532 }
 0x59f   :  { %v3218_v1 = vpop.permute.xlu0 %1537 }
 0x5a3   :  { %v1543_v59 = vpop.permute.xlu1 %1542 }
 0x5be   :  { %v1459_v10 = vpop.trf.xlu0 }
 0x5bf   :  { %v3222_v22 = vrot.slane %v1459_v10, %v3456_v36 }
 0x5c1   :  { %v1572_v31 = vadd.f32 %v3222_v22, %v1543_v59  ;;  %v1559_v39 = vadd.f32 %v3222_v22, %v1478_v61  ;;  %v1560_v53 = vadd.f32 %v3222_v22, %v1483_v4  ;;  %v1561_v42 = vadd.f32 %v3222_v22, %v1488_v51 }
 0x5c2   :  { %v1562_v23 = vadd.f32 %v3222_v22, %v1493_v38  ;;  %v1563_v11 = vadd.f32 %v3222_v22, %v1498_v33  ;;  %v1564_v61 = vadd.f32 %v3222_v22, %v1503_v62  ;;  %v1565_v38 = vadd.f32 %v3222_v22, %v1508_v25 }
 0x5c3   :  { %v1588_v30 = vmul.f32 0.2, %v1572_v31  ;;  %v1575_v45 = vmul.f32 0.2, %v1559_v39  ;;  %v1576_v0 = vmul.f32 0.2, %v1560_v53  ;;  %v1566_v36 = vadd.f32 %v3222_v22, %v1513_v18 }
 0x5c4   :  { %v1577_v16 = vmul.f32 0.2, %v1561_v42  ;;  %v1578_v21 = vmul.f32 0.2, %v1562_v23  ;;  %v1579_v46 = vmul.f32 0.2, %v1563_v11 }
 0x5c5   :  { %v1604_v28 = vmax.f32 %v1572_v31, %v1588_v30  ;;  %v1591_v12 = vmax.f32 %v1559_v39, %v1575_v45  ;;  %v1592_v19 = vmax.f32 %v1560_v53, %v1576_v0  ;;  %v1580_v51 = vmul.f32 0.2, %v1564_v61 }
 0x5c6   :  { %v1593_v49 = vmax.f32 %v1561_v42, %v1577_v16  ;;  %v1581_v10 = vmul.f32 0.2, %v1565_v38  ;;  %v1582_v59 = vmul.f32 0.2, %v1566_v36  ;;  %v1567_v31 = vadd.f32 %v3222_v22, %v1518_v13 }
 0x5c7   :  { %v3230_v56 = vadd.f32 %v1604_v28, %v2961_v44  ;;  %v3233_v60 = vadd.f32 %v1591_v12, %v2858_v3  ;;  %v3238_v9 = vadd.f32 %v1592_v19, %v2868_v20  ;;  %v1594_v3 = vmax.f32 %v1562_v23, %v1578_v21 }
 0x5c8   :  { %v3243_v44 = vadd.f32 %v1593_v49, %v2878_v34  ;;  %v1595_v20 = vmax.f32 %v1563_v11, %v1579_v46  ;;  %v1596_v34 = vmax.f32 %v1564_v61, %v1580_v51  ;;  %v1583_v39 = vmul.f32 0.2, %v1567_v31 }
 0x5c9   :  { %1649 = vmax.xlane.f32.xlu0 %v3230_v56  ;;  %1623 = vmax.xlane.f32.xlu1 %v3233_v60  ;;  %v3248_v4 = vadd.f32 %v1594_v3, %v2887_v15  ;;  %v1597_v15 = vmax.f32 %v1565_v38, %v1581_v10  ;;  %v1568_v53 = vadd.f32 %v3222_v22, %v1523_v32  ;;  %v3458_v3 = vld [vmem:[#allocation16_spill] sm:$0xff] }
 0x5ca   :  { %v3253_v33 = vadd.f32 %v1595_v20, %v2897_v52  ;;  %v3258_v62 = vadd.f32 %v1596_v34, %v2905_v63  ;;  %v1598_v52 = vmax.f32 %v1566_v36, %v1582_v59  ;;  %v1599_v63 = vmax.f32 %v1567_v31, %v1583_v39  ;;  %v3459_v20 = vld [vmem:[#allocation17_spill] sm:$0xff]  ;;  %v3460_v34 = vld [vmem:[#allocation18_spill] sm:$0xff] }
 0x5cb   :  { %v3263_v25 = vadd.f32 %v1597_v15, %v2913_v29  ;;  %v1584_v30 = vmul.f32 0.2, %v1568_v53  ;;  %v1569_v45 = vadd.f32 %v3222_v22, %v1528_v26  ;;  %v1570_v42 = vadd.f32 %v3222_v22, %v1533_v57  ;;  %v1548_v26 = vpop.permute.xlu1 %1547 }
 0x5cc   :  { %v3268_v18 = vadd.f32 %v1598_v52, %v2855_v2  ;;  %v3273_v13 = vadd.f32 %v1599_v63, %v2921_v5  ;;  %v1571_v12 = vadd.f32 %v3222_v22, %v3218_v1  ;;  %v1573_v57 = vadd.f32 %v3222_v22, %v1548_v26 }
 0x5cd   :  { %1625 = vmax.xlane.f32.xlu1 %v3238_v9  ;;  %v1600_v29 = vmax.f32 %v1568_v53, %v1584_v30  ;;  %v1585_v0 = vmul.f32 0.2, %v1569_v45  ;;  %v1586_v28 = vmul.f32 0.2, %v1570_v42 }
 0x5ce   :  { %v1587_v19 = vmul.f32 0.2, %v1571_v12  ;;  %v1589_v11 = vmul.f32 0.2, %v1573_v57 }
 0x5cf   :  { %v3278_v32 = vadd.f32 %v1600_v29, %v2929_v24  ;;  %v1601_v2 = vmax.f32 %v1569_v45, %v1585_v0  ;;  %v1602_v23 = vmax.f32 %v1570_v42, %v1586_v28  ;;  %v1553_v16 = vpop.permute.xlu1 %1552  ;;  %v3457_v24 = vld [vmem:[#allocation15_spill] sm:$0xff] }
 0x5d0   :  { %v1603_v21 = vmax.f32 %v1571_v12, %v1587_v19  ;;  %v1574_v1 = vadd.f32 %v3222_v22, %v1553_v16 }
 0x5d1   :  { %1627 = vmax.xlane.f32.xlu1 %v3243_v44  ;;  %v3284_v5 = vadd.f32 %v1601_v2, %v2937_v37  ;;  %v3289_v49 = vadd.f32 %v1602_v23, %v3457_v24  ;;  %v1605_v37 = vmax.f32 %v1573_v57, %v1589_v11 }
 0x5d2   :  { %v3294_v46 = vadd.f32 %v1603_v21, %v3458_v3  ;;  %v1590_v61 = vmul.f32 0.2, %v1574_v1 }
 0x5d3   :  { %v3298_v51 = vadd.f32 %v1605_v37, %v3459_v20 }
 0x5d4   :  { %v1606_v38 = vmax.f32 %v1574_v1, %v1590_v61 }
 0x5d5   :  { %1629 = vmax.xlane.f32.xlu1 %v3248_v4 }
 0x5d6   :  { %v3302_v10 = vadd.f32 %v1606_v38, %v3460_v34 }
 0x5d9   :  { %1631 = vmax.xlane.f32.xlu1 %v3253_v33 }
 0x5dd   :  { %1633 = vmax.xlane.f32.xlu1 %v3258_v62 }
 0x5e1   :  { %1635 = vmax.xlane.f32.xlu1 %v3263_v25 }
 0x5e5   :  { %1637 = vmax.xlane.f32.xlu1 %v3268_v18 }
 0x5e9   :  { %1639 = vmax.xlane.f32.xlu1 %v3273_v13 }
 0x5ed   :  { %1641 = vmax.xlane.f32.xlu1 %v3278_v32 }
 0x5f1   :  { %1643 = vmax.xlane.f32.xlu1 %v3284_v5 }
 0x5f5   :  { %1645 = vmax.xlane.f32.xlu1 %v3289_v49 }
 0x5f9   :  { %1647 = vmax.xlane.f32.xlu1 %v3294_v46 }
 0x5fd   :  { %1651 = vmax.xlane.f32.xlu1 %v3298_v51 }
 0x601   :  { %1653 = vmax.xlane.f32.xlu1 %v3302_v10 }
 0x656   :  { %v1624_v22 = vpop.xlane.xlu1 %1623  ;;  %v1650_v38 = vpop.xlane.xlu0 %1649 }
 0x657   :  { %v1655_v36 = vsub.f32 %v3233_v60, %v1624_v22 }
 0x659   :  { %v1671_v15 = vmul.f32 1.442695, %v1655_v36  ;;  %v1668_v36 = vsub.f32 %v3230_v56, %v1650_v38 }
 0x65a   :  { %v1626_v59 = vpop.xlane.xlu1 %1625 }
 0x65b   :  { %v1656_v31 = vsub.f32 %v3238_v9, %v1626_v59  ;;  %2418 = vpow2.f32 %v1671_v15 }
 0x65d   :  { %v1673_v52 = vmul.f32 1.442695, %v1656_v31 }
 0x65e   :  { %v1628_v39 = vpop.xlane.xlu1 %1627 }
 0x65f   :  { %2420 = vpow2.f32 %v1673_v52  ;;  %v1657_v53 = vsub.f32 %v3243_v44, %v1628_v39  ;;  %v1697_v52 = vmul.f32 1.442695, %v1668_v36 }
 0x661   :  { %v1675_v63 = vmul.f32 1.442695, %v1657_v53 }
 0x662   :  { %v1630_v30 = vpop.xlane.xlu1 %1629 }
 0x663   :  { %2422 = vpow2.f32 %v1675_v63  ;;  %v1658_v45 = vsub.f32 %v3248_v4, %v1630_v30 }
 0x665   :  { %v1677_v29 = vmul.f32 1.442695, %v1658_v45  ;;  %v3309_v0 = vpop.eup %2418 }
 0x666   :  { %v1632_v42 = vpop.xlane.xlu1 %1631  ;;  %1703 = vadd.xlane.f32.xlu1 %v3309_v0 }
 0x667   :  { %2424 = vpow2.f32 %v1677_v29  ;;  %v1659_v60 = vsub.f32 %v3253_v33, %v1632_v42 }
 0x669   :  { %v3313_v9 = vpop.eup %2420  ;;  %v1679_v2 = vmul.f32 1.442695, %v1659_v60 }
 0x66a   :  { %v1634_v28 = vpop.xlane.xlu1 %1633  ;;  %1705 = vadd.xlane.f32.xlu1 %v3313_v9 }
 0x66b   :  { %2426 = vpow2.f32 %v1679_v2  ;;  %v1660_v44 = vsub.f32 %v3258_v62, %v1634_v28 }
 0x66d   :  { %v3317_v12 = vpop.eup %2422  ;;  %v1681_v4 = vmul.f32 1.442695, %v1660_v44 }
 0x66e   :  { %v1636_v26 = vpop.xlane.xlu1 %1635  ;;  %1707 = vadd.xlane.f32.xlu1 %v3317_v12 }
 0x66f   :  { %2428 = vpow2.f32 %v1681_v4  ;;  %v1661_v23 = vsub.f32 %v3263_v25, %v1636_v26 }
 0x671   :  { %v3321_v19 = vpop.eup %2424  ;;  %v1683_v33 = vmul.f32 1.442695, %v1661_v23 }
 0x672   :  { %v1638_v57 = vpop.xlane.xlu1 %1637  ;;  %1709 = vadd.xlane.f32.xlu1 %v3321_v19 }
 0x673   :  { %2430 = vpow2.f32 %v1683_v33  ;;  %v1662_v16 = vsub.f32 %v3268_v18, %v1638_v57 }
 0x675   :  { %v3325_v24 = vpop.eup %2426  ;;  %v1685_v62 = vmul.f32 1.442695, %v1662_v16 }
 0x676   :  { %v1640_v21 = vpop.xlane.xlu1 %1639  ;;  %1711 = vadd.xlane.f32.xlu1 %v3325_v24 }
 0x677   :  { %2432 = vpow2.f32 %v1685_v62  ;;  %v1663_v11 = vsub.f32 %v3273_v13, %v1640_v21 }
 0x679   :  { %v3329_v1 = vpop.eup %2428  ;;  %v1687_v25 = vmul.f32 1.442695, %v1663_v11 }
 0x67a   :  { %v1642_v3 = vpop.xlane.xlu1 %1641  ;;  %1713 = vadd.xlane.f32.xlu1 %v3329_v1 }
 0x67b   :  { %2434 = vpow2.f32 %v1687_v25  ;;  %v1664_v37 = vsub.f32 %v3278_v32, %v1642_v3 }
 0x67d   :  { %v3333_v61 = vpop.eup %2430  ;;  %v1689_v18 = vmul.f32 1.442695, %v1664_v37 }
 0x67e   :  { %v1644_v20 = vpop.xlane.xlu1 %1643  ;;  %1715 = vadd.xlane.f32.xlu1 %v3333_v61 }
 0x67f   :  { %2436 = vpow2.f32 %v1689_v18  ;;  %v1665_v34 = vsub.f32 %v3284_v5, %v1644_v20 }
 0x681   :  { %v3337_v13 = vpop.eup %2432  ;;  %v1691_v22 = vmul.f32 1.442695, %v1665_v34 }
 0x682   :  { %v1646_v15 = vpop.xlane.xlu1 %1645  ;;  %1717 = vadd.xlane.f32.xlu1 %v3337_v13 }
 0x683   :  { %2438 = vpow2.f32 %v1691_v22  ;;  %v1666_v32 = vsub.f32 %v3289_v49, %v1646_v15 }
 0x685   :  { %v3342_v59 = vpop.eup %2434  ;;  %v1693_v31 = vmul.f32 1.442695, %v1666_v32 }
 0x686   :  { %v1648_v39 = vpop.xlane.xlu1 %1647  ;;  %1719 = vadd.xlane.f32.xlu1 %v3342_v59 }
 0x687   :  { %2440 = vpow2.f32 %v1693_v31  ;;  %v1667_v5 = vsub.f32 %v3294_v46, %v1648_v39 }
 0x688   :  { %2442 = vpow2.f32 %v1697_v52 }
 0x689   :  { %v3346_v53 = vpop.eup %2436  ;;  %v1695_v63 = vmul.f32 1.442695, %v1667_v5 }
 0x68a   :  { %1721 = vadd.xlane.f32.xlu0 %v3346_v53  ;;  %v1652_v56 = vpop.xlane.xlu1 %1651 }
 0x68b   :  { %2444 = vpow2.f32 %v1695_v63  ;;  %v1669_v49 = vsub.f32 %v3298_v51, %v1652_v56 }
 0x68d   :  { %v3350_v30 = vpop.eup %2438  ;;  %v1699_v45 = vmul.f32 1.442695, %v1669_v49 }
 0x68e   :  { %1723 = vadd.xlane.f32.xlu1 %v3350_v30  ;;  %v1654_v29 = vpop.xlane.xlu1 %1653 }
 0x68f   :  { %2446 = vpow2.f32 %v1699_v45  ;;  %v1670_v42 = vsub.f32 %v3302_v10, %v1654_v29 }
 0x691   :  { %v3354_v46 = vpop.eup %2440  ;;  %v1701_v60 = vmul.f32 1.442695, %v1670_v42 }
 0x692   :  { %1725 = vadd.xlane.f32.xlu0 %v3354_v46  ;;  %v3357_v2 = vpop.eup %2442 }
 0x693   :  { %2448 = vpow2.f32 %v1701_v60 }
 0x695   :  { %v3359_v28 = vpop.eup %2444 }
 0x696   :  { %1729 = vadd.xlane.f32.xlu0 %v3357_v2  ;;  %1727 = vadd.xlane.f32.xlu1 %v3359_v28 }
 0x699   :  { %v3363_v51 = vpop.eup %2446 }
 0x69a   :  { %1731 = vadd.xlane.f32.xlu1 %v3363_v51 }
 0x69d   :  { %v3366_v44 = vpop.eup %2448 }
 0x69e   :  { %1733 = vadd.xlane.f32.xlu0 %v3366_v44 }
 0x6f3   :  { %v1704_v10 = vpop.xlane.xlu1 %1703 }
 0x6f4   :  { %2450 = vrcp.f32 %v1704_v10 }
 0x6f7   :  { %v1706_v4 = vpop.xlane.xlu1 %1705 }
 0x6f8   :  { %2452 = vrcp.f32 %v1706_v4 }
 0x6fb   :  { %v1708_v26 = vpop.xlane.xlu1 %1707 }
 0x6fc   :  { %2454 = vrcp.f32 %v1708_v26 }
 0x6fe   :  { %v2451_v23 = vpop.eup %2450 }
 0x6ff   :  { %v1710_v33 = vpop.xlane.xlu1 %1709  ;;  %v1751_v57 = vmul.f32 %v2451_v23, %v3309_v0 }
 0x700   :  { %2456 = vrcp.f32 %v1710_v33 }
 0x701   :  { %2124 = vmatprep.mubr.f32.mxu1 %v1751_v57 }
 0x702   :  { %v2453_v16 = vpop.eup %2452 }
 0x703   :  { %v1752_v62 = vmul.f32 %v2453_v16, %v3313_v9  ;;  %v1712_v21 = vpop.xlane.xlu1 %1711 }
 0x704   :  { %2458 = vrcp.f32 %v1712_v21 }
 0x705   :  { %2125 = vmatmul.mubr.f32.vlgmr.msra.gmra.mrb[64].mxu1 %v1752_v62 }
 0x706   :  { %v2455_v11 = vpop.eup %2454 }
 0x707   :  { %v1714_v25 = vpop.xlane.xlu1 %1713  ;;  %v1753_v3 = vmul.f32 %v2455_v11, %v3317_v12 }
 0x708   :  { %2460 = vrcp.f32 %v1714_v25 }
 0x709   :  { %2127 = vmatprep.mubr.f32.mxu1 %v1753_v3 }
 0x70a   :  { %v2457_v37 = vpop.eup %2456 }
 0x70b   :  { %v1716_v18 = vpop.xlane.xlu1 %1715  ;;  %v1754_v20 = vmul.f32 %v2457_v37, %v3321_v19 }
 0x70c   :  { %2462 = vrcp.f32 %v1716_v18 }
 0x70d   :  { %2128 = vmatmul.mubr.f32.gmra.mrb[66].mxu1 %v1754_v20 }
 0x70e   :  { %v2459_v0 = vpop.eup %2458 }
 0x70f   :  { %v1718_v38 = vpop.xlane.xlu1 %1717  ;;  %v1755_v34 = vmul.f32 %v2459_v0, %v3325_v24 }
 0x710   :  { %2464 = vrcp.f32 %v1718_v38 }
 0x711   :  { %2130 = vmatprep.mubr.f32.mxu1 %v1755_v34 }
 0x712   :  { %v2461_v9 = vpop.eup %2460 }
 0x713   :  { %v1720_v22 = vpop.xlane.xlu1 %1719  ;;  %v1756_v36 = vmul.f32 %v2461_v9, %v3329_v1 }
 0x714   :  { %2466 = vrcp.f32 %v1720_v22 }
 0x715   :  { %2131 = vmatmul.mubr.f32.gmra.mrb[68].mxu1 %v1756_v36 }
 0x716   :  { %v2463_v12 = vpop.eup %2462 }
 0x717   :  { %v1722_v15 = vpop.xlane.xlu0 %1721  ;;  %v1757_v32 = vmul.f32 %v2463_v12, %v3333_v61 }
 0x718   :  { %2468 = vrcp.f32 %v1722_v15 }
 0x719   :  { %2133 = vmatprep.mubr.f32.mxu1 %v1757_v32 }
 0x71a   :  { %v2465_v19 = vpop.eup %2464 }
 0x71b   :  { %v1724_v31 = vpop.xlane.xlu1 %1723  ;;  %v1758_v52 = vmul.f32 %v2465_v19, %v3337_v13 }
 0x71c   :  { %2470 = vrcp.f32 %v1724_v31 }
 0x71d   :  { %2134 = vmatmul.mubr.f32.gmra.mrb[70].mxu1 %v1758_v52 }
 0x71e   :  { %v2467_v24 = vpop.eup %2466 }
 0x71f   :  { %v1726_v39 = vpop.xlane.xlu0 %1725  ;;  %v1759_v5 = vmul.f32 %v2467_v24, %v3342_v59 }
 0x720   :  { %2472 = vrcp.f32 %v1726_v39 }
 0x721   :  { %2136 = vmatprep.mubr.f32.mxu1 %v1759_v5 }
 0x722   :  { %v2469_v1 = vpop.eup %2468 }
 0x723   :  { %v1730_v63 = vpop.xlane.xlu0 %1729  ;;  %v1728_v56 = vpop.xlane.xlu1 %1727  ;;  %v1760_v49 = vmul.f32 %v2469_v1, %v3346_v53 }
 0x724   :  { %2474 = vrcp.f32 %v1730_v63 }
 0x725   :  { %2476 = vrcp.f32 %v1728_v56  ;;  %2137 = vmatmul.mubr.f32.gmra.mrb[72].mxu1 %v1760_v49 }
 0x726   :  { %v2471_v61 = vpop.eup %2470 }
 0x727   :  { %v1732_v45 = vpop.xlane.xlu1 %1731  ;;  %v1761_v29 = vmul.f32 %v2471_v61, %v3350_v30 }
 0x728   :  { %2478 = vrcp.f32 %v1732_v45 }
 0x729   :  { %2139 = vmatprep.mubr.f32.mxu1 %v1761_v29 }
 0x72a   :  { %v2473_v13 = vpop.eup %2472 }
 0x72b   :  { %v1734_v42 = vpop.xlane.xlu0 %1733  ;;  %v1762_v60 = vmul.f32 %v2473_v13, %v3354_v46  ;;  %v3388_v46 = vld [vmem:[%s3442_s5] ss:$0 sm:$0xff]  ;;  %s2611_s5 = smov [#allocation10]  }
 0x72c   :  { %2480 = vrcp.f32 %v1734_v42  ;;  %s1956_s26 = sshll.u32 %s2611_s5, 4  ;;  %s1957_s26 = int_to_ptr.vmem [resolvable:$true] %s1956_s26 }
 0x72d   :  { %2140 = vmatmul.mubr.f32.gmra.mrb[74].mxu1 %v1762_v60  ;;  %s2570_s27 = scalar_lea.vmem %s1957_s26, 2048  ;;  %p2575_p5 = scmp.lt.s32.totalorder %s1957_s26, %s1957_s26 }
 0x72e   :  { %v2475_v59 = vpop.eup %2474  ;;  %p2571_p4 = scmp.ne.s32.totalorder %s1957_s26, %s2570_s27  ;;  %p2576_p6 = scmp.lt.s32.totalorder %s2570_s27, %s2570_s27 }
 0x72f   :  { %v2477_v10 = vpop.eup %2476  ;;  %v1764_v4 = vmul.f32 %v2475_v59, %v3357_v2 }
 0x730   :  { %v1763_v53 = vmul.f32 %v2477_v10, %v3359_v28  ;;  %p2577_p7 = por %p2576_p6, %p2575_p5 }
 0x732   :  { %v2479_v26 = vpop.eup %2478  ;;  %2142 = vmatprep.mubr.f32.mxu1 %v1763_v53  ;;  %p2578_p8 = pnand %p2577_p7, %p2571_p4 }
 0x733   :  { %2143 = vmatmul.mubr.f32.gmra.mrb[76].mxu1 %v1764_v4  ;;  %v1765_v23 = vmul.f32 %v2479_v26, %v3363_v51 }
 0x735   :  { %2145 = vmatprep.mubr.f32.mxu1 %v1765_v23 }
 0x736   :  { %v2481_v30 = vpop.eup %2480 }
 0x737   :  { %v1766_v33 = vmul.f32 %v2481_v30, %v3366_v44 }
 0x739   :  { %2146 = vmatmul.mubr.f32.gmra.mrb[78].mxu1 %v1766_v33 }
 0x7d8   :  { %v2126_v57 = vpop.f32.mrb[64].mxu1 }
 0x7d9   :  { %v1839_v2 = vadd.f32 %v2126_v57, %v3168_v7  ;;  %v1833_v16 = vpop.f32.mrb[65].mxu1 }
 0x7da   :  { %v1834_v28 = vadd.f32 %v1833_v16, %v3164_v35 }
 0x7db   :  { %v1920_v62 = vadd.f32 %v3388_v46, %v1839_v2 }
 0x7dc   :  { %v1919_v51 = vadd.f32 %v3388_v46, %v1834_v28 }
 0x7dd   :  { %1936 = vst [vmem:[#allocation10 + $0x8] sm:$0xff] %v1920_v62 }
 0x7de   :  { %1935 = vst [vmem:[#allocation10] sm:$0xff] %v1919_v51 }
 0x7e0   :  { %v2129_v21 = vpop.f32.mrb[66].mxu1 }
 0x7e1   :  { %v1849_v44 = vadd.f32 %v2129_v21, %v3176_v50  ;;  %v1843_v11 = vpop.f32.mrb[67].mxu1 }
 0x7e2   :  { %v1844_v25 = vadd.f32 %v1843_v11, %v3172_v8 }
 0x7e3   :  { %v1922_v3 = vadd.f32 %v3388_v46, %v1849_v44 }
 0x7e4   :  { %v1921_v37 = vadd.f32 %v3388_v46, %v1844_v25 }
 0x7e5   :  { %1938 = vst [vmem:[#allocation10 + $0x18] sm:$0xff] %v1922_v3 }
 0x7e6   :  { %1937 = vst [vmem:[#allocation10 + $0x10] sm:$0xff] %v1921_v37 }
 0x7e8   :  { %v2132_v7 = vpop.f32.mrb[68].mxu1 }
 0x7e9   :  { %v1859_v35 = vadd.f32 %v2132_v7, %v3184_v48  ;;  %v1853_v18 = vpop.f32.mrb[69].mxu1 }
 0x7ea   :  { %v1854_v20 = vadd.f32 %v1853_v18, %v3180_v55 }
 0x7eb   :  { %v1924_v0 = vadd.f32 %v3388_v46, %v1859_v35 }
 0x7ec   :  { %v1923_v38 = vadd.f32 %v3388_v46, %v1854_v20 }
 0x7ed   :  { %1940 = vst [vmem:[#allocation10 + $0x28] sm:$0xff] %v1924_v0 }
 0x7ee   :  { %1939 = vst [vmem:[#allocation10 + $0x20] sm:$0xff] %v1923_v38 }
 0x7f0   :  { %v2135_v50 = vpop.f32.mrb[70].mxu1 }
 0x7f1   :  { %v1869_v8 = vadd.f32 %v2135_v50, %v3192_v43  ;;  %v1863_v34 = vpop.f32.mrb[71].mxu1 }
 0x7f2   :  { %v1864_v9 = vadd.f32 %v1863_v34, %v3188_v40 }
 0x7f3   :  { %v1926_v22 = vadd.f32 %v3388_v46, %v1869_v8 }
 0x7f4   :  { %v1925_v36 = vadd.f32 %v3388_v46, %v1864_v9 }
 0x7f5   :  { %1942 = vst [vmem:[#allocation10 + $0x38] sm:$0xff] %v1926_v22 }
 0x7f6   :  { %1941 = vst [vmem:[#allocation10 + $0x30] sm:$0xff] %v1925_v36 }
 0x7f8   :  { %v2138_v48 = vpop.f32.mrb[72].mxu1 }
 0x7f9   :  { %v1879_v55 = vadd.f32 %v2138_v48, %v3196_v17  ;;  %v1873_v12 = vpop.f32.mrb[73].mxu1 }
 0x7fa   :  { %v1874_v15 = vadd.f32 %v1873_v12, %v3194_v58 }
 0x7fb   :  { %v1928_v32 = vadd.f32 %v3388_v46, %v1879_v55 }
 0x7fc   :  { %v1927_v19 = vadd.f32 %v3388_v46, %v1874_v15 }
 0x7fd   :  { %1944 = vst [vmem:[#allocation10 + $0x48] sm:$0xff] %v1928_v32 }
 0x7fe   :  { %1943 = vst [vmem:[#allocation10 + $0x40] sm:$0xff] %v1927_v19 }
 0x800   :  { %v2141_v43 = vpop.f32.mrb[74].mxu1 }
 0x801   :  { %v1889_v40 = vadd.f32 %v2141_v43, %v3200_v14  ;;  %v1883_v31 = vpop.f32.mrb[75].mxu1 }
 0x802   :  { %v1884_v52 = vadd.f32 %v1883_v31, %v3198_v54 }
 0x803   :  { %v1930_v24 = vadd.f32 %v3388_v46, %v1889_v40 }
 0x804   :  { %v1929_v39 = vadd.f32 %v3388_v46, %v1884_v52 }
 0x805   :  { %1946 = vst [vmem:[#allocation10 + $0x58] sm:$0xff] %v1930_v24 }
 0x806   :  { %1945 = vst [vmem:[#allocation10 + $0x50] sm:$0xff] %v1929_v39  ;;  %v2144_v17 = vpop.f32.mrb[76].mxu1 }
 0x807   :  { %v1899_v58 = vadd.f32 %v2144_v17, %v3204_v41  ;;  %v1893_v5 = vpop.f32.mrb[77].mxu1 }
 0x808   :  { %v1894_v1 = vadd.f32 %v1893_v5, %v3202_v47 }
 0x809   :  { %v1932_v63 = vadd.f32 %v3388_v46, %v1899_v58 }
 0x80a   :  { %v1931_v56 = vadd.f32 %v3388_v46, %v1894_v1 }
 0x80b   :  { %1948 = vst [vmem:[#allocation10 + $0x68] sm:$0xff] %v1932_v63 }
 0x80c   :  { %1947 = vst [vmem:[#allocation10 + $0x60] sm:$0xff] %v1931_v56  ;;  %v2147_v14 = vpop.f32.mrb[78].mxu1 }
 0x80d   :  { %v1909_v54 = vadd.f32 %v2147_v14, %v3208_v27  ;;  %v1903_v49 = vpop.f32.mrb[79].mxu1 }
 0x80e   :  { %v1904_v61 = vadd.f32 %v1903_v49, %v3206_v6 }
 0x80f   :  { %v1934_v45 = vadd.f32 %v3388_v46, %v1909_v54 }
 0x810   :  { %v1933_v41 = vadd.f32 %v3388_v46, %v1904_v61 }
 0x811   :  { %1950 = vst [vmem:[#allocation10 + $0x78] sm:$0xff] %v1934_v45 }
 0x812   :  { %1949 = vst [vmem:[#allocation10 + $0x70] sm:$0xff] %v1933_v41 }
 0x813   :  { %2581 = shalt.err (!%p2578_p8)
}
 0x814   :  { %s2582_s30 = scalar_lea.hbm %s3443_s6, 2048 }
 0x815   :  { %p2583_p9 = scmp.ne.s32.totalorder %s3443_s6, %s2582_s30  ;;  %p2586_p10 = scmp.lt.u32.totalorder %s2582_s30, %s3443_s6 }
 0x817   :  { %p2588_p11 = pnand %p2586_p10, %p2583_p9 }
 0x819   :  { %2591 = shalt.err (!%p2588_p11)
}
 0x81a   :  { %1962 = dma.vmem_to_hbm [thread:$0]  %s1957_s26, 2048, %s3443_s6, [#allocation4], %s2602_s9, %s2602_s9, %s2603_s10  }
 0x81b   :  { %2598 = dma.done.wait [#allocation4], 2048  }
 0x81c   :  { %2599 = vsyncadd [#allocation4], 4294965248 }
 0x81d   :  { %1966 = vsyncpa [#allocation3], 1 }
 0x81e   :  { %1967 = vsyncpa [#allocation6], 1 }
 0x81f   :  { %1968 = vsyncpa [#allocation9], 1 }
 0x820   :  { %1969 = vsyncpa [#allocation4], 1 }

</bundles_post_ra>
